<compile_context>
chip_gen: v5e
topology: v5e:2x2
jax: 0.10.0
libtpu: 0.0.40
codegen_flags: <defaults>
</compile_context>

<pallas_src>
import functools
import math

import jax
import jax.numpy as jnp
from jax.experimental import pallas as pl
from jax.experimental.pallas import tpu as pltpu

LANE = 128  # lane width of a TPU vreg; all feature dims are padded to this.


def _nbytes_of(*arrays):
    return int(sum(math.prod(a.shape) * jnp.dtype(a.dtype).itemsize for a in arrays))


# ----------------------------- fused Pallas kernel ---------------------------

def byol_kernel(adj_ref, x_ref, pool_ref,
                w1_ref, b1_ref, w2_ref, b2_ref, gamma_ref, beta_ref,
                pw1_ref, pb1_ref, pw2_ref, pb2_ref,
                qw1_ref, qb1_ref, qg_ref, qb_ref, qw2_ref, qb2_ref,
                z_ref, p_ref, *, num_layers):
    """One grid step = one (branch, view):
       GIN encoder (all layers) -> global_add_pool -> projector -> predictor."""
    adj = adj_ref[...]                     # (N, N)   bf16 (0/1, exact)
    pool = pool_ref[...]                   # (G, N)   bf16 (0/1, exact)
    h = x_ref[...].astype(jnp.float32)     # (N, 128) activations carried in f32

    g_lin1 = None  # projector lin1 accumulated per layer segment: sum_l pooled_l @ W1[l]
    for l in range(num_layers):            # static trip count -> fully visible to LLO
        # GIN aggregation: (1+eps)*x + A@x  (eps = 0), f32 MXU accumulation.
        agg = h + jnp.dot(adj, h.astype(jnp.bfloat16),
                          preferred_element_type=jnp.float32)
        # GINConv MLP: Linear -> ReLU -> Linear, then the outer F.relu.
        t = jnp.dot(agg.astype(jnp.bfloat16), w1_ref[l],
                    preferred_element_type=jnp.float32) + b1_ref[l]
        t = jnp.maximum(t, 0.0)
        t = jnp.dot(t.astype(jnp.bfloat16), w2_ref[l],
                    preferred_element_type=jnp.float32) + b2_ref[l]
        t = jnp.maximum(t, 0.0)
        # BatchNorm1d (training-mode biased batch stats), two-pass centered variance.
        mean = jnp.mean(t, axis=0, keepdims=True)
        cen = t - mean
        var = jnp.mean(cen * cen, axis=0, keepdims=True)
        h = cen * jax.lax.rsqrt(var + 1e-5) * gamma_ref[l] + beta_ref[l]
        # global_add_pool fused directly into the projector's first Linear's
        # row-segment for this layer (equivalent to concat(pooled) @ W1).
        pooled = jnp.dot(pool, h.astype(jnp.bfloat16),
                         preferred_element_type=jnp.float32)
        seg = jnp.dot(pooled.astype(jnp.bfloat16), pw1_ref[l],
                      preferred_element_type=jnp.float32)
        g_lin1 = seg if g_lin1 is None else g_lin1 + seg
        # NOTE: per-layer h is never written back to HBM.

    # projector: Linear -> ReLU -> Linear
    z = jnp.maximum(g_lin1 + pb1_ref[...], 0.0)
    z = jnp.dot(z.astype(jnp.bfloat16), pw2_ref[...],
                preferred_element_type=jnp.float32) + pb2_ref[...]
    z_ref[...] = z

    # online predictor: Linear -> BatchNorm1d -> ReLU -> Linear.
    # Evaluated for both branches (negligible extra MACs) so one fused launch
    # covers the whole forward; only the online-branch slice is consumed.
    q = jnp.dot(z.astype(jnp.bfloat16), qw1_ref[...],
                preferred_element_type=jnp.float32) + qb1_ref[...]
    mean = jnp.mean(q, axis=0, keepdims=True)
    cen = q - mean
    var = jnp.mean(cen * cen, axis=0, keepdims=True)
    q = cen * jax.lax.rsqrt(var + 1e-5) * qg_ref[...] + qb_ref[...]
    q = jnp.maximum(q, 0.0)
    p_ref[...] = jnp.dot(q.astype(jnp.bfloat16), qw2_ref[...],
                         preferred_element_type=jnp.float32) + qb2_ref[...]


def byol_fused_call(adj, x, pool, br, pred):
    """adj:(V,N,N) x:(V,N,128) pool:(V,G,N) bf16; br: branch-stacked params (B,...);
       pred: online predictor params.  Returns z:(B,V,G,128), p:(B,V,G,128) f32."""
    V, N, _ = adj.shape
    G = pool.shape[1]
    B, L = br["enc_w1"].shape[:2]

    flops_per_step = (
        L * (2 * N * N * LANE + 2 * 2 * N * LANE * LANE
             + 2 * G * N * LANE + 2 * G * LANE * LANE)
        + 3 * 2 * G * LANE * LANE)
    ce = pl.CostEstimate(
        flops=int(B * V * flops_per_step),
        transcendentals=int(B * V * (L + 1) * LANE),
        bytes_accessed=_nbytes_of(adj, x, pool, *br.values(), *pred.values())
        + 2 * B * V * G * LANE * 4)

    def per_view(blk):
        return pl.BlockSpec(blk, lambda b, v: (v,) + (0,) * (len(blk) - 1))

    def per_branch(blk):
        return pl.BlockSpec(blk, lambda b, v: (b,) + (0,) * (len(blk) - 1))

    def shared(blk):
        return pl.BlockSpec(blk, lambda b, v: (0,) * len(blk))

    in_specs = [
        per_view((None, N, N)),             # adj   (per view)
        per_view((None, N, LANE)),          # x     (per view)
        per_view((None, G, N)),             # pool  (per view)
        per_branch((None, L, LANE, LANE)),  # encoder w1 (resident per branch)
        per_branch((None, L, 1, LANE)),     # encoder b1
        per_branch((None, L, LANE, LANE)),  # encoder w2
        per_branch((None, L, 1, LANE)),     # encoder b2
        per_branch((None, L, 1, LANE)),     # encoder bn gamma
        per_branch((None, L, 1, LANE)),     # encoder bn beta
        per_branch((None, L, LANE, LANE)),  # projector w1 (per-layer row segments)
        per_branch((None, 1, LANE)),        # projector b1
        per_branch((None, LANE, LANE)),     # projector w2
        per_branch((None, 1, LANE)),        # projector b2
        shared((LANE, LANE)),               # predictor w1 (online weights only)
        shared((1, LANE)),                  # predictor b1
        shared((1, LANE)),                  # predictor bn gamma
        shared((1, LANE)),                  # predictor bn beta
        shared((LANE, LANE)),               # predictor w2
        shared((1, LANE)),                  # predictor b2
    ]
    out_specs = (
        pl.BlockSpec((None, None, G, LANE), lambda b, v: (b, v, 0, 0)),  # z (projector)
        pl.BlockSpec((None, None, G, LANE), lambda b, v: (b, v, 0, 0)),  # p (predictor)
    )
    out_shape = (
        jax.ShapeDtypeStruct((B, V, G, LANE), jnp.float32),
        jax.ShapeDtypeStruct((B, V, G, LANE), jnp.float32),
    )

    return pl.pallas_call(
        functools.partial(byol_kernel, num_layers=L),
        grid=(B, V),
        in_specs=in_specs,
        out_specs=out_specs,
        out_shape=out_shape,
        compiler_params=pltpu.CompilerParams(
            dimension_semantics=("parallel", "parallel"),
            vmem_limit_bytes=32 * 1024 * 1024),
        cost_estimate=ce,
    )(adj, x, pool,
      br["enc_w1"], br["enc_b1"], br["enc_w2"], br["enc_b2"],
      br["enc_gamma"], br["enc_beta"],
      br["proj_w1"], br["proj_b1"], br["proj_w2"], br["proj_b2"],
      pred["w1"], pred["b1"], pred["gamma"], pred["beta"], pred["w2"], pred["b2"])


# ------------------------------- model pieces --------------------------------

def init_linear(key, din, dout):
    kw, kb = jax.random.split(key)
    w = jax.random.normal(kw, (din, dout), jnp.float32) * (1.0 / (din ** 0.5))
    b = jax.random.normal(kb, (1, dout), jnp.float32) * 0.01
    return {"w": w, "b": b}


def init_bn(dim):
    return {"gamma": jnp.ones((1, dim), jnp.float32),
            "beta": jnp.zeros((1, dim), jnp.float32)}


def init_byol_params(key, num_features, hidden_dim, num_gc_layers, bottleneck_dim):
    emb = hidden_dim * num_gc_layers
    keys = jax.random.split(key, 2 * num_gc_layers + 4)
    k = iter(keys)
    gin_layers = []
    for i in range(num_gc_layers):
        din = num_features if i == 0 else hidden_dim
        gin_layers.append({
            "lin1": init_linear(next(k), din, hidden_dim),
            "lin2": init_linear(next(k), hidden_dim, hidden_dim),
            "bn": init_bn(hidden_dim),
        })
    return {
        "encoder": gin_layers,
        "proj1": init_linear(next(k), emb, emb),
        "proj2": init_linear(next(k), emb, emb),
        "pred1": init_linear(next(k), emb, bottleneck_dim),
        "pred_bn": init_bn(bottleneck_dim),
        "pred2": init_linear(next(k), bottleneck_dim, emb),
    }


def _pad2d(a, rows, cols, fill=0.0):
    out = jnp.full((rows, cols), fill, a.dtype)
    return out.at[:a.shape[0], :a.shape[1]].set(a)


def pad_branch_params(params, hidden_dim, num_gc_layers):
    """Lane-pad encoder + projector weights of one branch and stack per-layer
    weights along a leading L axis.  Zero pad rows/cols (+ gamma=1, beta=0 in pad
    lanes) keep padded columns exactly zero through every layer."""
    enc = params["encoder"]
    return {
        "enc_w1": jnp.stack([_pad2d(l["lin1"]["w"], LANE, LANE) for l in enc]
                            ).astype(jnp.bfloat16),
        "enc_b1": jnp.stack([_pad2d(l["lin1"]["b"], 1, LANE) for l in enc]),
        "enc_w2": jnp.stack([_pad2d(l["lin2"]["w"], LANE, LANE) for l in enc]
                            ).astype(jnp.bfloat16),
        "enc_b2": jnp.stack([_pad2d(l["lin2"]["b"], 1, LANE) for l in enc]),
        "enc_gamma": jnp.stack([_pad2d(l["bn"]["gamma"], 1, LANE, fill=1.0) for l in enc]),
        "enc_beta": jnp.stack([_pad2d(l["bn"]["beta"], 1, LANE) for l in enc]),
        # projector lin1 split into per-layer row segments (hidden_dim rows each):
        # concat(pooled_l) @ W1  ==  sum_l pooled_l @ W1[l*hid:(l+1)*hid]
        "proj_w1": jnp.stack([
            _pad2d(params["proj1"]["w"][l * hidden_dim:(l + 1) * hidden_dim], LANE, LANE)
            for l in range(num_gc_layers)]).astype(jnp.bfloat16),
        "proj_b1": _pad2d(params["proj1"]["b"], 1, LANE),
        "proj_w2": _pad2d(params["proj2"]["w"], LANE, LANE).astype(jnp.bfloat16),
        "proj_b2": _pad2d(params["proj2"]["b"], 1, LANE),
    }


def pad_predictor_params(params):
    return {
        "w1": _pad2d(params["pred1"]["w"], LANE, LANE).astype(jnp.bfloat16),
        "b1": _pad2d(params["pred1"]["b"], 1, LANE),
        "gamma": _pad2d(params["pred_bn"]["gamma"], 1, LANE, fill=1.0),
        "beta": _pad2d(params["pred_bn"]["beta"], 1, LANE),
        "w2": _pad2d(params["pred2"]["w"], LANE, LANE).astype(jnp.bfloat16),
        "b2": _pad2d(params["pred2"]["b"], 1, LANE),
    }


@functools.partial(jax.jit, static_argnames=("emb_dim",))
def byol_forward(branch_dev, pred_dev, x, adj, pool, *, emb_dim):
    """Mirrors byol.forward(x1, x2) -> (p1_o, z2_t, p2_o, z1_t).
    Branch 0 = online, branch 1 = target; view axis = the two augmented graphs."""
    z, p = byol_fused_call(adj, x, pool, branch_dev, pred_dev)
    p1_o = p[0, 0, :, :emb_dim]
    p2_o = p[0, 1, :, :emb_dim]
    # target branch runs under torch.no_grad -> stop_gradient
    z1_t = jax.lax.stop_gradient(z[1, 0, :, :emb_dim])
    z2_t = jax.lax.stop_gradient(z[1, 1, :, :emb_dim])
    return p1_o, z2_t, p2_o, z1_t


# ----------------------------------- main ------------------------------------

def build_graph_batch(key, num_nodes, num_features, nodes_per_graph):
    """Synthetic PyG-style batch: ring graphs, dense adjacency + one-hot pool."""
    num_graphs = num_nodes // nodes_per_graph
    x = jax.random.normal(key, (num_nodes, num_features), jnp.float32)
    src, dst = [], []
    for g in range(num_graphs):
        off = g * nodes_per_graph
        for i in range(nodes_per_graph):
            a, b = off + i, off + (i + 1) % nodes_per_graph
            src += [a, b]
            dst += [b, a]
    src = jnp.asarray(src, jnp.int32)
    dst = jnp.asarray(dst, jnp.int32)
    batch_vec = jnp.repeat(jnp.arange(num_graphs, dtype=jnp.int32), nodes_per_graph)
    adj = jnp.zeros((num_nodes, num_nodes), jnp.float32).at[dst, src].add(1.0)
    pool = jnp.zeros((num_graphs, num_nodes), jnp.float32).at[
        batch_vec, jnp.arange(num_nodes)].set(1.0)
    return x, adj, pool


if __name__ == "__main__":
    # module hyper-parameters (small)
    dataset_num_features = 8
    hidden_dim = 16
    num_gc_layers = 2
    bottleneck_dim = 16
    embedding_dim = hidden_dim * num_gc_layers

    # graph batch: 3 graphs x 4 nodes = 12 nodes per view
    NODES, PER_GRAPH = 12, 4
    num_graphs = NODES // PER_GRAPH

    key = jax.random.PRNGKey(0)
    k_params, k_x1, k_x2 = jax.random.split(key, 3)

    online_params = init_byol_params(
        k_params, dataset_num_features, hidden_dim, num_gc_layers, bottleneck_dim)
    # target_encoder = copy.deepcopy(online_encoder) -> identical weights at init
    target_params = jax.tree_util.tree_map(lambda a: a, online_params)

    # stack online (branch 0) and target (branch 1) encoder+projector weights
    branch_dev = jax.tree_util.tree_map(
        lambda a, b: jnp.stack([a, b]),
        pad_branch_params(online_params, hidden_dim, num_gc_layers),
        pad_branch_params(target_params, hidden_dim, num_gc_layers))
    pred_dev = pad_predictor_params(online_params)

    x1, adj1, pool1 = build_graph_batch(k_x1, NODES, dataset_num_features, PER_GRAPH)
    x2, adj2, pool2 = build_graph_batch(k_x2, NODES, dataset_num_features, PER_GRAPH)

    # stack the two views; lane-pad node features to 128.  adjacency / pool are
    # 0/1 so the bf16 cast is exact.
    x_views = jnp.stack([_pad2d(x1, NODES, LANE),
                         _pad2d(x2, NODES, LANE)]).astype(jnp.bfloat16)
    adj_views = jnp.stack([adj1, adj2]).astype(jnp.bfloat16)
    pool_views = jnp.stack([pool1, pool2]).astype(jnp.bfloat16)

    p1_o, z2_t, p2_o, z1_t = byol_forward(
        branch_dev, pred_dev, x_views, adj_views, pool_views, emb_dim=embedding_dim)

    for t in (p1_o, z2_t, p2_o, z1_t):
        jax.block_until_ready(t)
        assert t.shape == (num_graphs, embedding_dim)
        assert bool(jnp.all(jnp.isfinite(t)))

    print("KERNEL_OK")
</pallas_src>

<mosaic_0001>
module attributes {stable_mosaic.version = 11 : i64} {
  func.func @byol_kernel(%arg0: i32, %arg1: i32, %arg2: memref<1x12x12xbf16, #tpu.memory_space<vmem>>, %arg3: memref<1x12x128xbf16, #tpu.memory_space<vmem>>, %arg4: memref<1x3x12xbf16, #tpu.memory_space<vmem>>, %arg5: memref<1x2x128x128xbf16, #tpu.memory_space<vmem>>, %arg6: memref<1x2x1x128xf32, #tpu.memory_space<vmem>>, %arg7: memref<1x2x128x128xbf16, #tpu.memory_space<vmem>>, %arg8: memref<1x2x1x128xf32, #tpu.memory_space<vmem>>, %arg9: memref<1x2x1x128xf32, #tpu.memory_space<vmem>>, %arg10: memref<1x2x1x128xf32, #tpu.memory_space<vmem>>, %arg11: memref<1x2x128x128xbf16, #tpu.memory_space<vmem>>, %arg12: memref<1x1x128xf32, #tpu.memory_space<vmem>>, %arg13: memref<1x128x128xbf16, #tpu.memory_space<vmem>>, %arg14: memref<1x1x128xf32, #tpu.memory_space<vmem>>, %arg15: memref<128x128xbf16, #tpu.memory_space<vmem>>, %arg16: memref<1x128xf32, #tpu.memory_space<vmem>>, %arg17: memref<1x128xf32, #tpu.memory_space<vmem>>, %arg18: memref<1x128xf32, #tpu.memory_space<vmem>>, %arg19: memref<128x128xbf16, #tpu.memory_space<vmem>>, %arg20: memref<1x128xf32, #tpu.memory_space<vmem>>, %arg21: memref<1x1x3x128xf32, #tpu.memory_space<vmem>>, %arg22: memref<1x1x3x128xf32, #tpu.memory_space<vmem>>) attributes {dimension_semantics = [#tpu.dimension_semantics<parallel>, #tpu.dimension_semantics<parallel>], iteration_bounds = array<i64: 2, 2>, scalar_prefetch = 0 : i64, scratch_operands = 0 : i64, tpu.core_type = #tpu.core_type<tc>, window_params = [{transform_indices = @transform_0, window_bounds = array<i64: 1, 12, 12>}, {transform_indices = @transform_1, window_bounds = array<i64: 1, 12, 128>}, {transform_indices = @transform_2, window_bounds = array<i64: 1, 3, 12>}, {transform_indices = @transform_3, window_bounds = array<i64: 1, 2, 128, 128>}, {transform_indices = @transform_4, window_bounds = array<i64: 1, 2, 1, 128>}, {transform_indices = @transform_5, window_bounds = array<i64: 1, 2, 128, 128>}, {transform_indices = @transform_6, window_bounds = array<i64: 1, 2, 1, 128>}, {transform_indices = @transform_7, window_bounds = array<i64: 1, 2, 1, 128>}, {transform_indices = @transform_8, window_bounds = array<i64: 1, 2, 1, 128>}, {transform_indices = @transform_9, window_bounds = array<i64: 1, 2, 128, 128>}, {transform_indices = @transform_10, window_bounds = array<i64: 1, 1, 128>}, {transform_indices = @transform_11, window_bounds = array<i64: 1, 128, 128>}, {transform_indices = @transform_12, window_bounds = array<i64: 1, 1, 128>}, {pipeline_mode = #tpu.pipeline_mode<synchronous>, transform_indices = @transform_13, window_bounds = array<i64: 128, 128>}, {pipeline_mode = #tpu.pipeline_mode<synchronous>, transform_indices = @transform_14, window_bounds = array<i64: 1, 128>}, {pipeline_mode = #tpu.pipeline_mode<synchronous>, transform_indices = @transform_15, window_bounds = array<i64: 1, 128>}, {pipeline_mode = #tpu.pipeline_mode<synchronous>, transform_indices = @transform_16, window_bounds = array<i64: 1, 128>}, {pipeline_mode = #tpu.pipeline_mode<synchronous>, transform_indices = @transform_17, window_bounds = array<i64: 128, 128>}, {pipeline_mode = #tpu.pipeline_mode<synchronous>, transform_indices = @transform_18, window_bounds = array<i64: 1, 128>}, {transform_indices = @transform_19, window_bounds = array<i64: 1, 1, 3, 128>}, {transform_indices = @transform_20, window_bounds = array<i64: 1, 1, 3, 128>}]} {
    %c0 = arith.constant 0 : index
    %c0_0 = arith.constant 0 : index
    %c0_1 = arith.constant 0 : index
    %0 = vector.load %arg2[%c0, %c0_0, %c0_1] : memref<1x12x12xbf16, #tpu.memory_space<vmem>>, vector<1x12x12xbf16>
    %1 = vector.shape_cast %0 : vector<1x12x12xbf16> to vector<12x12xbf16>
    %c0_2 = arith.constant 0 : index
    %c0_3 = arith.constant 0 : index
    %c0_4 = arith.constant 0 : index
    %2 = vector.load %arg4[%c0_2, %c0_3, %c0_4] : memref<1x3x12xbf16, #tpu.memory_space<vmem>>, vector<1x3x12xbf16>
    %3 = vector.shape_cast %2 : vector<1x3x12xbf16> to vector<3x12xbf16>
    %c0_5 = arith.constant 0 : index
    %c0_6 = arith.constant 0 : index
    %c0_7 = arith.constant 0 : index
    %4 = vector.load %arg3[%c0_5, %c0_6, %c0_7] : memref<1x12x128xbf16, #tpu.memory_space<vmem>>, vector<1x12x128xbf16>
    %5 = vector.shape_cast %4 : vector<1x12x128xbf16> to vector<12x128xbf16>
    %6 = arith.extf %5 : vector<12x128xbf16> to vector<12x128xf32>
    %7 = arith.truncf %6 : vector<12x128xf32> to vector<12x128xbf16>
    %cst = arith.constant dense<0.000000e+00> : vector<12x128xf32>
    %8 = tpu.matmul %1, %7, %cst {dimension_numbers = #tpu.dot_dimension_numbers<[1], [0], [0], [1], [0, 0, 1, 1], [], []>} : vector<12x12xbf16>, vector<12x128xbf16>, vector<12x128xf32> -> vector<12x128xf32>
    %9 = arith.addf %6, %8 : vector<12x128xf32>
    %10 = arith.truncf %9 : vector<12x128xf32> to vector<12x128xbf16>
    %c0_8 = arith.constant 0 : index
    %c0_9 = arith.constant 0 : index
    %c0_10 = arith.constant 0 : index
    %c0_11 = arith.constant 0 : index
    %11 = vector.load %arg5[%c0_8, %c0_9, %c0_10, %c0_11] : memref<1x2x128x128xbf16, #tpu.memory_space<vmem>>, vector<1x1x128x128xbf16>
    %12 = vector.shape_cast %11 : vector<1x1x128x128xbf16> to vector<128x128xbf16>
    %cst_12 = arith.constant dense<0.000000e+00> : vector<12x128xf32>
    %13 = tpu.matmul %10, %12, %cst_12 {dimension_numbers = #tpu.dot_dimension_numbers<[1], [0], [0], [1], [0, 0, 1, 1], [], []>} : vector<12x128xbf16>, vector<128x128xbf16>, vector<12x128xf32> -> vector<12x128xf32>
    %c0_13 = arith.constant 0 : index
    %c0_14 = arith.constant 0 : index
    %c0_15 = arith.constant 0 : index
    %c0_16 = arith.constant 0 : index
    %14 = vector.load %arg6[%c0_13, %c0_14, %c0_15, %c0_16] : memref<1x2x1x128xf32, #tpu.memory_space<vmem>>, vector<1x1x1x128xf32>
    %15 = vector.shape_cast %14 : vector<1x1x1x128xf32> to vector<1x128xf32>
    %16 = vector.broadcast %15 : vector<1x128xf32> to vector<12x128xf32>
    %17 = arith.addf %13, %16 : vector<12x128xf32>
    %cst_17 = arith.constant 0.000000e+00 : f32
    %18 = vector.broadcast %cst_17 : f32 to vector<12x128xf32>
    %19 = arith.maximumf %17, %18 : vector<12x128xf32>
    %20 = arith.truncf %19 : vector<12x128xf32> to vector<12x128xbf16>
    %c0_18 = arith.constant 0 : index
    %c0_19 = arith.constant 0 : index
    %c0_20 = arith.constant 0 : index
    %c0_21 = arith.constant 0 : index
    %21 = vector.load %arg7[%c0_18, %c0_19, %c0_20, %c0_21] : memref<1x2x128x128xbf16, #tpu.memory_space<vmem>>, vector<1x1x128x128xbf16>
    %22 = vector.shape_cast %21 : vector<1x1x128x128xbf16> to vector<128x128xbf16>
    %cst_22 = arith.constant dense<0.000000e+00> : vector<12x128xf32>
    %23 = tpu.matmul %20, %22, %cst_22 {dimension_numbers = #tpu.dot_dimension_numbers<[1], [0], [0], [1], [0, 0, 1, 1], [], []>} : vector<12x128xbf16>, vector<128x128xbf16>, vector<12x128xf32> -> vector<12x128xf32>
    %c0_23 = arith.constant 0 : index
    %c0_24 = arith.constant 0 : index
    %c0_25 = arith.constant 0 : index
    %c0_26 = arith.constant 0 : index
    %24 = vector.load %arg8[%c0_23, %c0_24, %c0_25, %c0_26] : memref<1x2x1x128xf32, #tpu.memory_space<vmem>>, vector<1x1x1x128xf32>
    %25 = vector.shape_cast %24 : vector<1x1x1x128xf32> to vector<1x128xf32>
    %26 = vector.broadcast %25 : vector<1x128xf32> to vector<12x128xf32>
    %27 = arith.addf %23, %26 : vector<12x128xf32>
    %cst_27 = arith.constant 0.000000e+00 : f32
    %28 = vector.broadcast %cst_27 : f32 to vector<12x128xf32>
    %29 = arith.maximumf %27, %28 : vector<12x128xf32>
    %cst_28 = arith.constant dense<0.000000e+00> : vector<128xf32>
    %30 = vector.multi_reduction <add>, %29, %cst_28 [0] : vector<12x128xf32> to vector<128xf32>
    %31 = vector.shape_cast %30 : vector<128xf32> to vector<1x128xf32>
    %cst_29 = arith.constant 1.200000e+01 : f32
    %32 = vector.broadcast %cst_29 : f32 to vector<1x128xf32>
    %33 = arith.divf %31, %32 : vector<1x128xf32>
    %34 = vector.broadcast %33 : vector<1x128xf32> to vector<12x128xf32>
    %35 = arith.subf %29, %34 : vector<12x128xf32>
    %36 = arith.mulf %35, %35 : vector<12x128xf32>
    %cst_30 = arith.constant dense<0.000000e+00> : vector<128xf32>
    %37 = vector.multi_reduction <add>, %36, %cst_30 [0] : vector<12x128xf32> to vector<128xf32>
    %38 = vector.shape_cast %37 : vector<128xf32> to vector<1x128xf32>
    %cst_31 = arith.constant 1.200000e+01 : f32
    %39 = vector.broadcast %cst_31 : f32 to vector<1x128xf32>
    %40 = arith.divf %38, %39 : vector<1x128xf32>
    %cst_32 = arith.constant 9.99999974E-6 : f32
    %41 = vector.broadcast %cst_32 : f32 to vector<1x128xf32>
    %42 = arith.addf %40, %41 : vector<1x128xf32>
    %43 = math.rsqrt %42 : vector<1x128xf32>
    %44 = vector.broadcast %43 : vector<1x128xf32> to vector<12x128xf32>
    %45 = arith.mulf %35, %44 : vector<12x128xf32>
    %c0_33 = arith.constant 0 : index
    %c0_34 = arith.constant 0 : index
    %c0_35 = arith.constant 0 : index
    %c0_36 = arith.constant 0 : index
    %46 = vector.load %arg9[%c0_33, %c0_34, %c0_35, %c0_36] : memref<1x2x1x128xf32, #tpu.memory_space<vmem>>, vector<1x1x1x128xf32>
    %47 = vector.shape_cast %46 : vector<1x1x1x128xf32> to vector<1x128xf32>
    %48 = vector.broadcast %47 : vector<1x128xf32> to vector<12x128xf32>
    %49 = arith.mulf %45, %48 : vector<12x128xf32>
    %c0_37 = arith.constant 0 : index
    %c0_38 = arith.constant 0 : index
    %c0_39 = arith.constant 0 : index
    %c0_40 = arith.constant 0 : index
    %50 = vector.load %arg10[%c0_37, %c0_38, %c0_39, %c0_40] : memref<1x2x1x128xf32, #tpu.memory_space<vmem>>, vector<1x1x1x128xf32>
    %51 = vector.shape_cast %50 : vector<1x1x1x128xf32> to vector<1x128xf32>
    %52 = vector.broadcast %51 : vector<1x128xf32> to vector<12x128xf32>
    %53 = arith.addf %49, %52 : vector<12x128xf32>
    %54 = arith.truncf %53 : vector<12x128xf32> to vector<12x128xbf16>
    %cst_41 = arith.constant dense<0.000000e+00> : vector<3x128xf32>
    %55 = tpu.matmul %3, %54, %cst_41 {dimension_numbers = #tpu.dot_dimension_numbers<[1], [0], [0], [1], [0, 0, 1, 1], [], []>} : vector<3x12xbf16>, vector<12x128xbf16>, vector<3x128xf32> -> vector<3x128xf32>
    %56 = arith.truncf %55 : vector<3x128xf32> to vector<3x128xbf16>
    %c0_42 = arith.constant 0 : index
    %c0_43 = arith.constant 0 : index
    %c0_44 = arith.constant 0 : index
    %c0_45 = arith.constant 0 : index
    %57 = vector.load %arg11[%c0_42, %c0_43, %c0_44, %c0_45] : memref<1x2x128x128xbf16, #tpu.memory_space<vmem>>, vector<1x1x128x128xbf16>
    %58 = vector.shape_cast %57 : vector<1x1x128x128xbf16> to vector<128x128xbf16>
    %cst_46 = arith.constant dense<0.000000e+00> : vector<3x128xf32>
    %59 = tpu.matmul %56, %58, %cst_46 {dimension_numbers = #tpu.dot_dimension_numbers<[1], [0], [0], [1], [0, 0, 1, 1], [], []>} : vector<3x128xbf16>, vector<128x128xbf16>, vector<3x128xf32> -> vector<3x128xf32>
    %60 = arith.truncf %53 : vector<12x128xf32> to vector<12x128xbf16>
    %cst_47 = arith.constant dense<0.000000e+00> : vector<12x128xf32>
    %61 = tpu.matmul %1, %60, %cst_47 {dimension_numbers = #tpu.dot_dimension_numbers<[1], [0], [0], [1], [0, 0, 1, 1], [], []>} : vector<12x12xbf16>, vector<12x128xbf16>, vector<12x128xf32> -> vector<12x128xf32>
    %62 = arith.addf %53, %61 : vector<12x128xf32>
    %63 = arith.truncf %62 : vector<12x128xf32> to vector<12x128xbf16>
    %c0_48 = arith.constant 0 : index
    %c1 = arith.constant 1 : index
    %c0_49 = arith.constant 0 : index
    %c0_50 = arith.constant 0 : index
    %64 = vector.load %arg5[%c0_48, %c1, %c0_49, %c0_50] : memref<1x2x128x128xbf16, #tpu.memory_space<vmem>>, vector<1x1x128x128xbf16>
    %65 = vector.shape_cast %64 : vector<1x1x128x128xbf16> to vector<128x128xbf16>
    %cst_51 = arith.constant dense<0.000000e+00> : vector<12x128xf32>
    %66 = tpu.matmul %63, %65, %cst_51 {dimension_numbers = #tpu.dot_dimension_numbers<[1], [0], [0], [1], [0, 0, 1, 1], [], []>} : vector<12x128xbf16>, vector<128x128xbf16>, vector<12x128xf32> -> vector<12x128xf32>
    %c0_52 = arith.constant 0 : index
    %c1_53 = arith.constant 1 : index
    %c0_54 = arith.constant 0 : index
    %c0_55 = arith.constant 0 : index
    %67 = vector.load %arg6[%c0_52, %c1_53, %c0_54, %c0_55] : memref<1x2x1x128xf32, #tpu.memory_space<vmem>>, vector<1x1x1x128xf32>
    %68 = vector.shape_cast %67 : vector<1x1x1x128xf32> to vector<1x128xf32>
    %69 = vector.broadcast %68 : vector<1x128xf32> to vector<12x128xf32>
    %70 = arith.addf %66, %69 : vector<12x128xf32>
    %cst_56 = arith.constant 0.000000e+00 : f32
    %71 = vector.broadcast %cst_56 : f32 to vector<12x128xf32>
    %72 = arith.maximumf %70, %71 : vector<12x128xf32>
    %73 = arith.truncf %72 : vector<12x128xf32> to vector<12x128xbf16>
    %c0_57 = arith.constant 0 : index
    %c1_58 = arith.constant 1 : index
    %c0_59 = arith.constant 0 : index
    %c0_60 = arith.constant 0 : index
    %74 = vector.load %arg7[%c0_57, %c1_58, %c0_59, %c0_60] : memref<1x2x128x128xbf16, #tpu.memory_space<vmem>>, vector<1x1x128x128xbf16>
    %75 = vector.shape_cast %74 : vector<1x1x128x128xbf16> to vector<128x128xbf16>
    %cst_61 = arith.constant dense<0.000000e+00> : vector<12x128xf32>
    %76 = tpu.matmul %73, %75, %cst_61 {dimension_numbers = #tpu.dot_dimension_numbers<[1], [0], [0], [1], [0, 0, 1, 1], [], []>} : vector<12x128xbf16>, vector<128x128xbf16>, vector<12x128xf32> -> vector<12x128xf32>
    %c0_62 = arith.constant 0 : index
    %c1_63 = arith.constant 1 : index
    %c0_64 = arith.constant 0 : index
    %c0_65 = arith.constant 0 : index
    %77 = vector.load %arg8[%c0_62, %c1_63, %c0_64, %c0_65] : memref<1x2x1x128xf32, #tpu.memory_space<vmem>>, vector<1x1x1x128xf32>
    %78 = vector.shape_cast %77 : vector<1x1x1x128xf32> to vector<1x128xf32>
    %79 = vector.broadcast %78 : vector<1x128xf32> to vector<12x128xf32>
    %80 = arith.addf %76, %79 : vector<12x128xf32>
    %cst_66 = arith.constant 0.000000e+00 : f32
    %81 = vector.broadcast %cst_66 : f32 to vector<12x128xf32>
    %82 = arith.maximumf %80, %81 : vector<12x128xf32>
    %cst_67 = arith.constant dense<0.000000e+00> : vector<128xf32>
    %83 = vector.multi_reduction <add>, %82, %cst_67 [0] : vector<12x128xf32> to vector<128xf32>
    %84 = vector.shape_cast %83 : vector<128xf32> to vector<1x128xf32>
    %cst_68 = arith.constant 1.200000e+01 : f32
    %85 = vector.broadcast %cst_68 : f32 to vector<1x128xf32>
    %86 = arith.divf %84, %85 : vector<1x128xf32>
    %87 = vector.broadcast %86 : vector<1x128xf32> to vector<12x128xf32>
    %88 = arith.subf %82, %87 : vector<12x128xf32>
    %89 = arith.mulf %88, %88 : vector<12x128xf32>
    %cst_69 = arith.constant dense<0.000000e+00> : vector<128xf32>
    %90 = vector.multi_reduction <add>, %89, %cst_69 [0] : vector<12x128xf32> to vector<128xf32>
    %91 = vector.shape_cast %90 : vector<128xf32> to vector<1x128xf32>
    %cst_70 = arith.constant 1.200000e+01 : f32
    %92 = vector.broadcast %cst_70 : f32 to vector<1x128xf32>
    %93 = arith.divf %91, %92 : vector<1x128xf32>
    %cst_71 = arith.constant 9.99999974E-6 : f32
    %94 = vector.broadcast %cst_71 : f32 to vector<1x128xf32>
    %95 = arith.addf %93, %94 : vector<1x128xf32>
    %96 = math.rsqrt %95 : vector<1x128xf32>
    %97 = vector.broadcast %96 : vector<1x128xf32> to vector<12x128xf32>
    %98 = arith.mulf %88, %97 : vector<12x128xf32>
    %c0_72 = arith.constant 0 : index
    %c1_73 = arith.constant 1 : index
    %c0_74 = arith.constant 0 : index
    %c0_75 = arith.constant 0 : index
    %99 = vector.load %arg9[%c0_72, %c1_73, %c0_74, %c0_75] : memref<1x2x1x128xf32, #tpu.memory_space<vmem>>, vector<1x1x1x128xf32>
    %100 = vector.shape_cast %99 : vector<1x1x1x128xf32> to vector<1x128xf32>
    %101 = vector.broadcast %100 : vector<1x128xf32> to vector<12x128xf32>
    %102 = arith.mulf %98, %101 : vector<12x128xf32>
    %c0_76 = arith.constant 0 : index
    %c1_77 = arith.constant 1 : index
    %c0_78 = arith.constant 0 : index
    %c0_79 = arith.constant 0 : index
    %103 = vector.load %arg10[%c0_76, %c1_77, %c0_78, %c0_79] : memref<1x2x1x128xf32, #tpu.memory_space<vmem>>, vector<1x1x1x128xf32>
    %104 = vector.shape_cast %103 : vector<1x1x1x128xf32> to vector<1x128xf32>
    %105 = vector.broadcast %104 : vector<1x128xf32> to vector<12x128xf32>
    %106 = arith.addf %102, %105 : vector<12x128xf32>
    %107 = arith.truncf %106 : vector<12x128xf32> to vector<12x128xbf16>
    %cst_80 = arith.constant dense<0.000000e+00> : vector<3x128xf32>
    %108 = tpu.matmul %3, %107, %cst_80 {dimension_numbers = #tpu.dot_dimension_numbers<[1], [0], [0], [1], [0, 0, 1, 1], [], []>} : vector<3x12xbf16>, vector<12x128xbf16>, vector<3x128xf32> -> vector<3x128xf32>
    %109 = arith.truncf %108 : vector<3x128xf32> to vector<3x128xbf16>
    %c0_81 = arith.constant 0 : index
    %c1_82 = arith.constant 1 : index
    %c0_83 = arith.constant 0 : index
    %c0_84 = arith.constant 0 : index
    %110 = vector.load %arg11[%c0_81, %c1_82, %c0_83, %c0_84] : memref<1x2x128x128xbf16, #tpu.memory_space<vmem>>, vector<1x1x128x128xbf16>
    %111 = vector.shape_cast %110 : vector<1x1x128x128xbf16> to vector<128x128xbf16>
    %cst_85 = arith.constant dense<0.000000e+00> : vector<3x128xf32>
    %112 = tpu.matmul %109, %111, %cst_85 {dimension_numbers = #tpu.dot_dimension_numbers<[1], [0], [0], [1], [0, 0, 1, 1], [], []>} : vector<3x128xbf16>, vector<128x128xbf16>, vector<3x128xf32> -> vector<3x128xf32>
    %113 = arith.addf %59, %112 : vector<3x128xf32>
    %c0_86 = arith.constant 0 : index
    %c0_87 = arith.constant 0 : index
    %c0_88 = arith.constant 0 : index
    %114 = vector.load %arg12[%c0_86, %c0_87, %c0_88] : memref<1x1x128xf32, #tpu.memory_space<vmem>>, vector<1x1x128xf32>
    %115 = vector.shape_cast %114 : vector<1x1x128xf32> to vector<1x128xf32>
    %116 = vector.broadcast %115 : vector<1x128xf32> to vector<3x128xf32>
    %117 = arith.addf %113, %116 : vector<3x128xf32>
    %cst_89 = arith.constant 0.000000e+00 : f32
    %118 = vector.broadcast %cst_89 : f32 to vector<3x128xf32>
    %119 = arith.maximumf %117, %118 : vector<3x128xf32>
    %120 = arith.truncf %119 : vector<3x128xf32> to vector<3x128xbf16>
    %c0_90 = arith.constant 0 : index
    %c0_91 = arith.constant 0 : index
    %c0_92 = arith.constant 0 : index
    %121 = vector.load %arg13[%c0_90, %c0_91, %c0_92] : memref<1x128x128xbf16, #tpu.memory_space<vmem>>, vector<1x128x128xbf16>
    %122 = vector.shape_cast %121 : vector<1x128x128xbf16> to vector<128x128xbf16>
    %cst_93 = arith.constant dense<0.000000e+00> : vector<3x128xf32>
    %123 = tpu.matmul %120, %122, %cst_93 {dimension_numbers = #tpu.dot_dimension_numbers<[1], [0], [0], [1], [0, 0, 1, 1], [], []>} : vector<3x128xbf16>, vector<128x128xbf16>, vector<3x128xf32> -> vector<3x128xf32>
    %c0_94 = arith.constant 0 : index
    %c0_95 = arith.constant 0 : index
    %c0_96 = arith.constant 0 : index
    %124 = vector.load %arg14[%c0_94, %c0_95, %c0_96] : memref<1x1x128xf32, #tpu.memory_space<vmem>>, vector<1x1x128xf32>
    %125 = vector.shape_cast %124 : vector<1x1x128xf32> to vector<1x128xf32>
    %126 = vector.broadcast %125 : vector<1x128xf32> to vector<3x128xf32>
    %127 = arith.addf %123, %126 : vector<3x128xf32>
    %c0_97 = arith.constant 0 : index
    %c0_98 = arith.constant 0 : index
    %c0_99 = arith.constant 0 : index
    %c0_100 = arith.constant 0 : index
    %128 = vector.load %arg21[%c0_97, %c0_98, %c0_99, %c0_100] : memref<1x1x3x128xf32, #tpu.memory_space<vmem>>, vector<1x1x3x128xf32>
    %129 = vector.shape_cast %128 : vector<1x1x3x128xf32> to vector<3x128xf32>
    %130 = vector.shape_cast %127 : vector<3x128xf32> to vector<1x1x3x128xf32>
    tpu.vector_store %arg21[%c0_97, %c0_98, %c0_99, %c0_100], %130 {strides = array<i32>} : memref<1x1x3x128xf32, #tpu.memory_space<vmem>>, vector<1x1x3x128xf32>,
    %131 = arith.truncf %127 : vector<3x128xf32> to vector<3x128xbf16>
    %c0_101 = arith.constant 0 : index
    %c0_102 = arith.constant 0 : index
    %132 = vector.load %arg15[%c0_101, %c0_102] : memref<128x128xbf16, #tpu.memory_space<vmem>>, vector<128x128xbf16>
    %cst_103 = arith.constant dense<0.000000e+00> : vector<3x128xf32>
    %133 = tpu.matmul %131, %132, %cst_103 {dimension_numbers = #tpu.dot_dimension_numbers<[1], [0], [0], [1], [0, 0, 1, 1], [], []>} : vector<3x128xbf16>, vector<128x128xbf16>, vector<3x128xf32> -> vector<3x128xf32>
    %c0_104 = arith.constant 0 : index
    %c0_105 = arith.constant 0 : index
    %134 = vector.load %arg16[%c0_104, %c0_105] : memref<1x128xf32, #tpu.memory_space<vmem>>, vector<1x128xf32>
    %135 = vector.broadcast %134 : vector<1x128xf32> to vector<3x128xf32>
    %136 = arith.addf %133, %135 : vector<3x128xf32>
    %cst_106 = arith.constant dense<0.000000e+00> : vector<128xf32>
    %137 = vector.multi_reduction <add>, %136, %cst_106 [0] : vector<3x128xf32> to vector<128xf32>
    %138 = vector.shape_cast %137 : vector<128xf32> to vector<1x128xf32>
    %cst_107 = arith.constant 3.000000e+00 : f32
    %139 = vector.broadcast %cst_107 : f32 to vector<1x128xf32>
    %140 = arith.divf %138, %139 : vector<1x128xf32>
    %141 = vector.broadcast %140 : vector<1x128xf32> to vector<3x128xf32>
    %142 = arith.subf %136, %141 : vector<3x128xf32>
    %143 = arith.mulf %142, %142 : vector<3x128xf32>
    %cst_108 = arith.constant dense<0.000000e+00> : vector<128xf32>
    %144 = vector.multi_reduction <add>, %143, %cst_108 [0] : vector<3x128xf32> to vector<128xf32>
    %145 = vector.shape_cast %144 : vector<128xf32> to vector<1x128xf32>
    %cst_109 = arith.constant 3.000000e+00 : f32
    %146 = vector.broadcast %cst_109 : f32 to vector<1x128xf32>
    %147 = arith.divf %145, %146 : vector<1x128xf32>
    %cst_110 = arith.constant 9.99999974E-6 : f32
    %148 = vector.broadcast %cst_110 : f32 to vector<1x128xf32>
    %149 = arith.addf %147, %148 : vector<1x128xf32>
    %150 = math.rsqrt %149 : vector<1x128xf32>
    %151 = vector.broadcast %150 : vector<1x128xf32> to vector<3x128xf32>
    %152 = arith.mulf %142, %151 : vector<3x128xf32>
    %c0_111 = arith.constant 0 : index
    %c0_112 = arith.constant 0 : index
    %153 = vector.load %arg17[%c0_111, %c0_112] : memref<1x128xf32, #tpu.memory_space<vmem>>, vector<1x128xf32>
    %154 = vector.broadcast %153 : vector<1x128xf32> to vector<3x128xf32>
    %155 = arith.mulf %152, %154 : vector<3x128xf32>
    %c0_113 = arith.constant 0 : index
    %c0_114 = arith.constant 0 : index
    %156 = vector.load %arg18[%c0_113, %c0_114] : memref<1x128xf32, #tpu.memory_space<vmem>>, vector<1x128xf32>
    %157 = vector.broadcast %156 : vector<1x128xf32> to vector<3x128xf32>
    %158 = arith.addf %155, %157 : vector<3x128xf32>
    %cst_115 = arith.constant 0.000000e+00 : f32
    %159 = vector.broadcast %cst_115 : f32 to vector<3x128xf32>
    %160 = arith.maximumf %158, %159 : vector<3x128xf32>
    %161 = arith.truncf %160 : vector<3x128xf32> to vector<3x128xbf16>
    %c0_116 = arith.constant 0 : index
    %c0_117 = arith.constant 0 : index
    %162 = vector.load %arg19[%c0_116, %c0_117] : memref<128x128xbf16, #tpu.memory_space<vmem>>, vector<128x128xbf16>
    %cst_118 = arith.constant dense<0.000000e+00> : vector<3x128xf32>
    %163 = tpu.matmul %161, %162, %cst_118 {dimension_numbers = #tpu.dot_dimension_numbers<[1], [0], [0], [1], [0, 0, 1, 1], [], []>} : vector<3x128xbf16>, vector<128x128xbf16>, vector<3x128xf32> -> vector<3x128xf32>
    %c0_119 = arith.constant 0 : index
    %c0_120 = arith.constant 0 : index
    %164 = vector.load %arg20[%c0_119, %c0_120] : memref<1x128xf32, #tpu.memory_space<vmem>>, vector<1x128xf32>
    %165 = vector.broadcast %164 : vector<1x128xf32> to vector<3x128xf32>
    %166 = arith.addf %163, %165 : vector<3x128xf32>
    %c0_121 = arith.constant 0 : index
    %c0_122 = arith.constant 0 : index
    %c0_123 = arith.constant 0 : index
    %c0_124 = arith.constant 0 : index
    %167 = vector.load %arg22[%c0_121, %c0_122, %c0_123, %c0_124] : memref<1x1x3x128xf32, #tpu.memory_space<vmem>>, vector<1x1x3x128xf32>
    %168 = vector.shape_cast %167 : vector<1x1x3x128xf32> to vector<3x128xf32>
    %169 = vector.shape_cast %166 : vector<3x128xf32> to vector<1x1x3x128xf32>
    tpu.vector_store %arg22[%c0_121, %c0_122, %c0_123, %c0_124], %169 {strides = array<i32>} : memref<1x1x3x128xf32, #tpu.memory_space<vmem>>, vector<1x1x3x128xf32>,
    return
  }
  func.func @transform_0(%arg0: i32, %arg1: i32) -> (i32, i32, i32) {
    %c0_i32 = arith.constant 0 : i32
    %c0_i32_0 = arith.constant 0 : i32
    %c0_i32_1 = arith.constant 0 : i32
    return %arg1, %c0_i32, %c0_i32_0 : i32, i32, i32
  }
  func.func @transform_1(%arg0: i32, %arg1: i32) -> (i32, i32, i32) {
    %c0_i32 = arith.constant 0 : i32
    %c0_i32_0 = arith.constant 0 : i32
    %c0_i32_1 = arith.constant 0 : i32
    return %arg1, %c0_i32, %c0_i32_0 : i32, i32, i32
  }
  func.func @transform_2(%arg0: i32, %arg1: i32) -> (i32, i32, i32) {
    %c0_i32 = arith.constant 0 : i32
    %c0_i32_0 = arith.constant 0 : i32
    %c0_i32_1 = arith.constant 0 : i32
    return %arg1, %c0_i32, %c0_i32_0 : i32, i32, i32
  }
  func.func @transform_3(%arg0: i32, %arg1: i32) -> (i32, i32, i32, i32) {
    %c0_i32 = arith.constant 0 : i32
    %c0_i32_0 = arith.constant 0 : i32
    %c0_i32_1 = arith.constant 0 : i32
    %c0_i32_2 = arith.constant 0 : i32
    return %arg0, %c0_i32, %c0_i32_0, %c0_i32_1 : i32, i32, i32, i32
  }
  func.func @transform_4(%arg0: i32, %arg1: i32) -> (i32, i32, i32, i32) {
    %c0_i32 = arith.constant 0 : i32
    %c0_i32_0 = arith.constant 0 : i32
    %c0_i32_1 = arith.constant 0 : i32
    %c0_i32_2 = arith.constant 0 : i32
    return %arg0, %c0_i32, %c0_i32_0, %c0_i32_1 : i32, i32, i32, i32
  }
  func.func @transform_5(%arg0: i32, %arg1: i32) -> (i32, i32, i32, i32) {
    %c0_i32 = arith.constant 0 : i32
    %c0_i32_0 = arith.constant 0 : i32
    %c0_i32_1 = arith.constant 0 : i32
    %c0_i32_2 = arith.constant 0 : i32
    return %arg0, %c0_i32, %c0_i32_0, %c0_i32_1 : i32, i32, i32, i32
  }
  func.func @transform_6(%arg0: i32, %arg1: i32) -> (i32, i32, i32, i32) {
    %c0_i32 = arith.constant 0 : i32
    %c0_i32_0 = arith.constant 0 : i32
    %c0_i32_1 = arith.constant 0 : i32
    %c0_i32_2 = arith.constant 0 : i32
    return %arg0, %c0_i32, %c0_i32_0, %c0_i32_1 : i32, i32, i32, i32
  }
  func.func @transform_7(%arg0: i32, %arg1: i32) -> (i32, i32, i32, i32) {
    %c0_i32 = arith.constant 0 : i32
    %c0_i32_0 = arith.constant 0 : i32
    %c0_i32_1 = arith.constant 0 : i32
    %c0_i32_2 = arith.constant 0 : i32
    return %arg0, %c0_i32, %c0_i32_0, %c0_i32_1 : i32, i32, i32, i32
  }
  func.func @transform_8(%arg0: i32, %arg1: i32) -> (i32, i32, i32, i32) {
    %c0_i32 = arith.constant 0 : i32
    %c0_i32_0 = arith.constant 0 : i32
    %c0_i32_1 = arith.constant 0 : i32
    %c0_i32_2 = arith.constant 0 : i32
    return %arg0, %c0_i32, %c0_i32_0, %c0_i32_1 : i32, i32, i32, i32
  }
  func.func @transform_9(%arg0: i32, %arg1: i32) -> (i32, i32, i32, i32) {
    %c0_i32 = arith.constant 0 : i32
    %c0_i32_0 = arith.constant 0 : i32
    %c0_i32_1 = arith.constant 0 : i32
    %c0_i32_2 = arith.constant 0 : i32
    return %arg0, %c0_i32, %c0_i32_0, %c0_i32_1 : i32, i32, i32, i32
  }
  func.func @transform_10(%arg0: i32, %arg1: i32) -> (i32, i32, i32) {
    %c0_i32 = arith.constant 0 : i32
    %c0_i32_0 = arith.constant 0 : i32
    %c0_i32_1 = arith.constant 0 : i32
    return %arg0, %c0_i32, %c0_i32_0 : i32, i32, i32
  }
  func.func @transform_11(%arg0: i32, %arg1: i32) -> (i32, i32, i32) {
    %c0_i32 = arith.constant 0 : i32
    %c0_i32_0 = arith.constant 0 : i32
    %c0_i32_1 = arith.constant 0 : i32
    return %arg0, %c0_i32, %c0_i32_0 : i32, i32, i32
  }
  func.func @transform_12(%arg0: i32, %arg1: i32) -> (i32, i32, i32) {
    %c0_i32 = arith.constant 0 : i32
    %c0_i32_0 = arith.constant 0 : i32
    %c0_i32_1 = arith.constant 0 : i32
    return %arg0, %c0_i32, %c0_i32_0 : i32, i32, i32
  }
  func.func @transform_13(%arg0: i32, %arg1: i32) -> (i32, i32) {
    %c0_i32 = arith.constant 0 : i32
    %c0_i32_0 = arith.constant 0 : i32
    %c0_i32_1 = arith.constant 0 : i32
    return %c0_i32, %c0_i32_0 : i32, i32
  }
  func.func @transform_14(%arg0: i32, %arg1: i32) -> (i32, i32) {
    %c0_i32 = arith.constant 0 : i32
    %c0_i32_0 = arith.constant 0 : i32
    %c0_i32_1 = arith.constant 0 : i32
    return %c0_i32, %c0_i32_0 : i32, i32
  }
  func.func @transform_15(%arg0: i32, %arg1: i32) -> (i32, i32) {
    %c0_i32 = arith.constant 0 : i32
    %c0_i32_0 = arith.constant 0 : i32
    %c0_i32_1 = arith.constant 0 : i32
    return %c0_i32, %c0_i32_0 : i32, i32
  }
  func.func @transform_16(%arg0: i32, %arg1: i32) -> (i32, i32) {
    %c0_i32 = arith.constant 0 : i32
    %c0_i32_0 = arith.constant 0 : i32
    %c0_i32_1 = arith.constant 0 : i32
    return %c0_i32, %c0_i32_0 : i32, i32
  }
  func.func @transform_17(%arg0: i32, %arg1: i32) -> (i32, i32) {
    %c0_i32 = arith.constant 0 : i32
    %c0_i32_0 = arith.constant 0 : i32
    %c0_i32_1 = arith.constant 0 : i32
    return %c0_i32, %c0_i32_0 : i32, i32
  }
  func.func @transform_18(%arg0: i32, %arg1: i32) -> (i32, i32) {
    %c0_i32 = arith.constant 0 : i32
    %c0_i32_0 = arith.constant 0 : i32
    %c0_i32_1 = arith.constant 0 : i32
    return %c0_i32, %c0_i32_0 : i32, i32
  }
  func.func @transform_19(%arg0: i32, %arg1: i32) -> (i32, i32, i32, i32) {
    %c0_i32 = arith.constant 0 : i32
    %c0_i32_0 = arith.constant 0 : i32
    %c0_i32_1 = arith.constant 0 : i32
    return %arg0, %arg1, %c0_i32, %c0_i32_0 : i32, i32, i32, i32
  }
  func.func @transform_20(%arg0: i32, %arg1: i32) -> (i32, i32, i32, i32) {
    %c0_i32 = arith.constant 0 : i32
    %c0_i32_0 = arith.constant 0 : i32
    %c0_i32_1 = arith.constant 0 : i32
    return %arg0, %arg1, %c0_i32, %c0_i32_0 : i32, i32, i32, i32
  }
}

</mosaic_0001>

<bundles_post_ra>
// kernel: byol_forward.1
= control target key start
LH: loop header
LB: loop body
LE: loop exit
PB: predicated region body
PF: predicated region fallthrough
CT: control target
= control target key end

     0   :  { %s4439_s0 = inlined_call_operand.vmem [shape: bf16[2,12,12], index: 0, kind: input, shape index: {}]   ;;  %s4440_s1 = inlined_call_operand.vmem [shape: bf16[2,12,128], index: 1, kind: input, shape index: {}]   ;;  %s4441_s2 = inlined_call_operand.vmem [shape: bf16[2,3,12], index: 2, kind: input, shape index: {}]   ;;  %s4442_s3 = inlined_call_operand.hbm [shape: bf16[2,2,128,128], index: 3, kind: input, shape index: {}]   ;;  %s4443_s4 = inlined_call_operand.hbm [shape: f32[2,2,1,128], index: 4, kind: input, shape index: {}]   ;;  %s4444_s5 = inlined_call_operand.hbm [shape: bf16[2,2,128,128], index: 5, kind: input, shape index: {}]   ;;  %s4445_s6 = inlined_call_operand.hbm [shape: f32[2,2,1,128], index: 6, kind: input, shape index: {}]   ;;  %s4446_s7 = inlined_call_operand.hbm [shape: f32[2,2,1,128], index: 7, kind: input, shape index: {}]   ;;  %s4447_s8 = inlined_call_operand.hbm [shape: f32[2,2,1,128], index: 8, kind: input, shape index: {}]   ;;  %s4448_s9 = inlined_call_operand.hbm [shape: bf16[2,2,128,128], index: 9, kind: input, shape index: {}]   ;;  %s4449_s10 = inlined_call_operand.hbm [shape: f32[2,1,128], index: 10, kind: input, shape index: {}]   ;;  %s4450_s11 = inlined_call_operand.hbm [shape: bf16[2,128,128], index: 11, kind: input, shape index: {}]   ;;  %s4451_s12 = inlined_call_operand.hbm [shape: f32[2,1,128], index: 12, kind: input, shape index: {}]   ;;  %s4452_s13 = inlined_call_operand.vmem [shape: bf16[128,128], index: 13, kind: input, shape index: {}]   ;;  %s4453_s14 = inlined_call_operand.hbm [shape: f32[1,128], index: 14, kind: input, shape index: {}]   ;;  %s4454_s15 = inlined_call_operand.hbm [shape: f32[1,128], index: 15, kind: input, shape index: {}]   ;;  %s4455_s16 = inlined_call_operand.hbm [shape: f32[1,128], index: 16, kind: input, shape index: {}]   ;;  %s4456_s17 = inlined_call_operand.hbm [shape: bf16[128,128], index: 17, kind: input, shape index: {}]   ;;  %s4457_s18 = inlined_call_operand.hbm [shape: f32[1,128], index: 18, kind: input, shape index: {}]   ;;  %s4458_s19 = inlined_call_operand.vmem [shape: f32[2,2,3,128], index: 19, kind: output, shape index: {0}]   ;;  %s4459_s20 = inlined_call_operand.vmem [shape: f32[2,2,3,128], index: 20, kind: output, shape index: {1}]  }
   0x1   :  { %4482 = sst [smem:[#allocation44_spill]] %s4439_s0 }
   0x2   :  { %4483 = sst [smem:[#allocation45_spill]] %s4440_s1 }
   0x3   :  { %4484 = sst [smem:[#allocation46_spill]] %s4441_s2 }
   0x4   :  { %4485 = sst [smem:[#allocation47_spill]] %s4442_s3 }
   0x5   :  { %4486 = sst [smem:[#allocation48_spill]] %s4443_s4 }
   0x6   :  { %4487 = sst [smem:[#allocation49_spill]] %s4444_s5 }
   0x7   :  { %4488 = sst [smem:[#allocation50_spill]] %s4445_s6 }
   0x8   :  { %4489 = sst [smem:[#allocation51_spill]] %s4447_s8 }
   0x9   :  { %4490 = sst [smem:[#allocation52_spill]] %s4449_s10 }
   0xa   :  { %4491 = sst [smem:[#allocation53_spill]] %s4452_s13 }
   0xb   :  { %4492 = sst [smem:[#allocation54_spill]] %s4453_s14 }
   0xc   :  { %4493 = sst [smem:[#allocation55_spill]] %s4454_s15 }
   0xd   :  { %4494 = sst [smem:[#allocation56_spill]] %s4455_s16 }
   0xe   :  { %4495 = sst [smem:[#allocation57_spill]] %s4456_s17 }
   0xf   :  { %4496 = sst [smem:[#allocation58_spill]] %s4458_s19 }
  0x10   :  { %4497 = sst [smem:[#allocation59_spill]] %s4459_s20 }
  0x11   :  { %26 = vsyncpa [#allocation3], 0 }
  0x12   :  { %28 = vsyncpa [#allocation3 + $0x1], 0 }
  0x13   :  { %29 = vsyncpa [#allocation5], 0 }
  0x14   :  { %31 = vsyncpa [#allocation5 + $0x1], 0 }
  0x15   :  { %32 = vsyncpa [#allocation8], 0 }
  0x16   :  { %34 = vsyncpa [#allocation8 + $0x1], 0 }
  0x17   :  { %35 = vsyncpa [#allocation11], 0 }
  0x18   :  { %37 = vsyncpa [#allocation11 + $0x1], 0 }
  0x19   :  { %38 = vsyncpa [#allocation14], 0 }
  0x1a   :  { %40 = vsyncpa [#allocation14 + $0x1], 0 }
  0x1b   :  { %41 = vsyncpa [#allocation17], 0 }
  0x1c   :  { %43 = vsyncpa [#allocation17 + $0x1], 0 }
  0x1d   :  { %44 = vsyncpa [#allocation20], 0 }
  0x1e   :  { %45 = vsyncpa [#allocation23], 0  ;;  %s3933_s1 = smov 0   ;;  %s3935_s22 = smov 0  }
  0x1f   :  { %s3937_s23 = smov 0   ;;  %s3939_s24 = smov 0  }
  0x20   :  { %s3941_s2 = smov 0   ;;  %s3943_s25 = smov 0  }
  0x21   :  { %s3945_s3 = smov 0   ;;  %s3947_s26 = smov 0  }
  0x22 LB: > { %4498 = sst [smem:[#allocation34_spill]] %s3795_s23  ;;  %s4460_s27 = sadd.s32 4294967295, %s3815_s26   ;;  %s3815_s26 = sphi %s3947_s26, %s51_s26   ;;  %s3811_s3 = sphi %s3945_s3, %s4554_s3   ;;  %s3807_s25 = sphi %s3943_s25, %s4549_s25   ;;  %s3803_s2 = sphi %s3941_s2, %s4553_s2   ;;  %s3799_s24 = sphi %s3939_s24, %s4548_s24   ;;  %s3795_s23 = sphi %s3937_s23, %s4547_s23   ;;  %s3791_s22 = sphi %s3935_s22, %s4552_s22   ;;  %s3787_s1 = sphi %s3933_s1, %s4551_s1  }
  0x23   : > { %4499 = sst [smem:[#allocation35_spill]] %s3799_s24  ;;  %p155_p0 = scmp.ne.s32.totalorder %s3795_s23, %s3791_s22 }
  0x24   : > { %4500 = sst [smem:[#allocation36_spill]] %s3803_s2  ;;  %p156_p1 = scmp.eq.s32.totalorder %s3815_s26, 0 }
  0x25   : > { %4501 = sst [smem:[#allocation37_spill]] %s3807_s25  ;;  %p161_p2 = scmp.ne.s32.totalorder %s3791_s22, %s3787_s1 }
  0x26   : > { %4502 = sst [smem:[#allocation38_spill]] %s3815_s26  ;;  %p3979_p3 = scmp.eq.s32.totalorder %s4460_s27, 0 }
  0x27   : > { %p3983_p4 = por %p156_p1, %p155_p0  ;;  %p2586_p5 = scmp.ge.s32.totalorder %s3815_s26, 1 }
  0x28   : > { %s4503_s4 = scalar_select %p3979_p3, 1, 0 }
  0x29   : > { %p3990_p6 = por %p3979_p3, %p161_p2  ;;  %p588_p7 = scmp.lt.s32.totalorder %s3815_s26, 5 }
  0x2a   : > { %4504 = sst [smem:[#allocation39_spill]] %s4503_s4  ;;  %s3817_s28 = smov [#allocation18]  }
  0x2b   : > { %s4506_s30 = scalar_select %p3990_p6, 1, 0 }
  0x2c   : > { %s4508_s14 = sld [smem:[#allocation54_spill]]  ;;  %p3998_p8 = pnand %p2586_p5, %p588_p7 }
  0x2d   : > { %4507 = sst [smem:[#allocation40_spill]] %s4506_s30  ;;  %s605_s20 = sshll.u32 %s3817_s28, 4  ;;  %s606_s20 = int_to_ptr.vmem [resolvable:$true] %s605_s20 }
  0x2e   : > { %p3110_p9 = pneg %p3998_p8  ;;  %p3162_p10 = scmp.lt.s32.totalorder %s3815_s26, 4 }
  0x2f   : > { %s4511_s15 = sld [smem:[#allocation55_spill]]  ;;  %s3818_s28 = smov [#allocation19]  }
  0x30   : > { %p4007_p11 = pnand %p3110_p9, %p3979_p3  ;;  %p4016_p12 = pnand %p3162_p10, %p3983_p4 }
  0x31   : > { %s617_s13 = sshll.u32 %s3818_s28, 4  ;;  %s4513_s17 = sld [smem:[#allocation57_spill]]  ;;  %s618_s13 = int_to_ptr.vmem [resolvable:$true] %s617_s13 }
  0x32   : > { %s603_s1 = sshll.u32 %s4508_s14, 4  ;;  %s3819_s29 = smov [#allocation22]   ;;  %s604_s1 = int_to_ptr.hbm [resolvable:$true] %s603_s1 }
  0x33   : > { %3113 = dma.hbm_to_vmem [thread:$0]  (!%p4007_p11), %s604_s1, 16, %s606_s20, [#allocation17]  }
  0x34   : > { %s4468_s4 = smov 64   ;;  %s4470_s30 = smov 4  }
  0x35   : > { %s615_s21 = sshll.u32 %s4511_s15, 4  ;;  %s640_s15 = sshll.u32 %s3819_s29, 4  ;;  %s616_s21 = int_to_ptr.hbm [resolvable:$true] %s615_s21  ;;  %s641_s15 = int_to_ptr.vmem [resolvable:$true] %s640_s15 }
  0x36   : > { %3116 = dma.hbm_to_vmem [thread:$0]  (!%p4007_p11), %s616_s21, 16, %s618_s13, [#allocation20]  }
  0x37   : > { %s638_s24 = sshll.u32 %s4513_s17, 4  ;;  %s60_s20 = sadd.s32 1, %s3807_s25  ;;  %s639_s24 = int_to_ptr.hbm [resolvable:$true] %s638_s24 }
  0x38   : > { %3122 = dma.hbm_to_vmem [thread:$0]  (!%p4007_p11), %s639_s24, 1024, %s641_s15, [#allocation23], %s4468_s4, %s4468_s4, %s4470_s30  }
  0x39   : > { %s63_s1 = sadd.s32 1, %s3811_s3  ;;  %p61_p13 = scmp.ge.s32.totalorder %s60_s20, 2 }
  0x3a   : > { %s4035_s28 = sand.u32 1, %s3795_s23   ;;  %s4038_s13 = sand.u32 1, %s3815_s26  }
  0x3b   : > { %s4041_s21 = sshll.u32 %s4035_s28, 1  ;;  %s4556_s20 = smov (%p61_p13, %s60_s20), 0 }
  0x3c   : > { %4514 = sst [smem:[#allocation41_spill]] %s4556_s20  ;;  %s4558_s1 = smov (!%p61_p13, %s63_s1), %s3811_s3 }
  0x3d   : > { %p65_p0 = scmp.ge.s32.totalorder %s4558_s1, 2  ;;  %s4047_s15 = sshll.u32 %s3811_s3, 1 }
  0x3e   : > { %s4515_s0 = sld [smem:[#allocation48_spill]]  ;;  %s715_s4 = scalar_lea.vmem [#allocation4], %s4041_s21 }
  0x3f   : > { %s722_s30 = sshll.u32 %s715_s4, 4  ;;  %s4560_s1 = smov (%p65_p0, %s4558_s1), 0  ;;  %s723_s30 = int_to_ptr.vmem [resolvable:$true] %s722_s30 }
  0x40   : > { %4516 = sst [smem:[#allocation42_spill]] %s4560_s1  ;;  %s145_s20 = ssub.s32 %s3811_s3, %s4560_s1 }
  0x41   : > { %p146_p1 = scmp.eq.s32.totalorder %s145_s20, 0  ;;  %s4517_s25 = sadd.s32 1, %s3795_s23 }
  0x42   : > { %s4476_s2 = scalar_lea.sflag [#allocation5], %s4038_s13  ;;  %s4481_s26 = smov 1  }
  0x43   : > { %s4061_s24 = scalar_select %p146_p1, %s3795_s23, %s4517_s25  }
  0x44   : > { %s719_s29 = scalar_lea.hbm %s4515_s0, %s4047_s15  ;;  %s4479_s0 = smov 16  }
  0x45   : > { %s720_s17 = sshll.u32 %s719_s29, 4  ;;  %4518 = sst [smem:[#allocation43_spill]] %s4061_s24  ;;  %s721_s17 = int_to_ptr.hbm [resolvable:$true] %s720_s17 }
  0x46   : > { %3132 = dma.hbm_to_vmem [thread:$0]  (!%p4016_p12), %s721_s17, 32, %s723_s30, %s4476_s2, %s4479_s0, %s4479_s0, %s4481_s26  }
  0x47   : > { %s4519_s6 = sld [smem:[#allocation50_spill]]  ;;  %s758_s25 = scalar_lea.vmem [#allocation7], %s4041_s21 }
  0x48   : > { %s765_s24 = sshll.u32 %s758_s25, 4  ;;  %s4477_s23 = scalar_lea.sflag [#allocation8], %s4038_s13  ;;  %s766_s24 = int_to_ptr.vmem [resolvable:$true] %s765_s24 }
  0x49   : > { %s4520_s8 = sld [smem:[#allocation51_spill]]  ;;  %s4478_s25 = scalar_lea.sflag [#allocation11], %s4038_s13 }
  0x4a   : > { %s4521_s10 = sld [smem:[#allocation52_spill]]  ;;  %s690_s19 = scalar_lea.sflag [#allocation3], %s4035_s28 }
  0x4b   : > { %s4522_s16 = sld [smem:[#allocation56_spill]] }
  0x4c   : > { %s4526_s5 = sld [smem:[#allocation49_spill]] }
  0x4d   : > { %s762_s1 = scalar_lea.hbm %s4519_s6, %s4047_s15 }
  0x4e   : > { %s763_s20 = sshll.u32 %s762_s1, 4  ;;  %s800_s1 = scalar_lea.vmem [#allocation10], %s4041_s21  ;;  %s764_s20 = int_to_ptr.hbm [resolvable:$true] %s763_s20 }
  0x4f   : > { %3138 = dma.hbm_to_vmem [thread:$0]  (!%p4016_p12), %s764_s20, 32, %s766_s24, %s4477_s23, %s4479_s0, %s4479_s0, %s4481_s26  }
  0x50   : > { %s804_s4 = scalar_lea.hbm %s4520_s8, %s4047_s15  ;;  %s807_s29 = sshll.u32 %s800_s1, 4  ;;  %s808_s29 = int_to_ptr.vmem [resolvable:$true] %s807_s29 }
  0x51   : > { %s805_s2 = sshll.u32 %s804_s4, 4  ;;  %s845_s17 = scalar_lea.hbm %s4521_s10, %s3811_s3  ;;  %s806_s2 = int_to_ptr.hbm [resolvable:$true] %s805_s2 }
  0x52   : > { %3144 = dma.hbm_to_vmem [thread:$0]  (!%p4016_p12), %s806_s2, 32, %s808_s29, %s4478_s25, %s4479_s0, %s4479_s0, %s4481_s26  }
  0x53   : > { %s847_s30 = sshll.u32 %s845_s17, 4  ;;  %s842_s23 = scalar_lea.vmem [#allocation13], %s4035_s28  ;;  %s848_s30 = int_to_ptr.hbm [resolvable:$true] %s847_s30 }
  0x54   : > { %s849_s6 = sshll.u32 %s842_s23, 4  ;;  %s4480_s4 = scalar_lea.sflag [#allocation14], %s4038_s13  ;;  %s850_s6 = int_to_ptr.vmem [resolvable:$true] %s849_s6 }
  0x55   : > { %3150 = dma.hbm_to_vmem [thread:$0]  (!%p4016_p12), %s848_s30, 16, %s850_s6, %s4480_s4  }
  0x56   : > { %s627_s2 = sshll.u32 %s4522_s16, 4  ;;  %s3824_s29 = smov [#allocation21]   ;;  %s628_s2 = int_to_ptr.hbm [resolvable:$true] %s627_s2 }
  0x57   : > { %s629_s24 = sshll.u32 %s3824_s29, 4  ;;  %s653_s23 = sshll.u32 %s4457_s18, 4  ;;  %s630_s24 = int_to_ptr.vmem [resolvable:$true] %s629_s24  ;;  %s654_s23 = int_to_ptr.hbm [resolvable:$true] %s653_s23 }
  0x58   : > { %3119 = dma.hbm_to_vmem [thread:$0]  (!%p4007_p11), %s628_s2, 16, %s630_s24, [#allocation20]  }
  0x59   : > { %s3825_s25 = smov [#allocation24]   ;;  %s4116_s6 = sshll.u32 %s4035_s28, 7 }
  0x5a   : > { %s655_s0 = sshll.u32 %s3825_s25, 4  ;;  %s2990_s8 = sshll.u32 %s3811_s3, 7  ;;  %s656_s0 = int_to_ptr.vmem [resolvable:$true] %s655_s0 }
  0x5b   : > { %3125 = dma.hbm_to_vmem [thread:$0]  (!%p4007_p11), %s654_s23, 16, %s656_s0, [#allocation23]  }
  0x5c   : > { %s4523_s29 = sld [smem:[#allocation47_spill]]  ;;  %s693_s2 = scalar_lea.vmem [#allocation2], %s4116_s6 }
  0x5d   : > { %s701_s24 = sshll.u32 %s693_s2, 4  ;;  %s4524_s25 = smov 4   ;;  %s702_s24 = int_to_ptr.vmem [resolvable:$true] %s701_s24 }
  0x5e   : > { %s4525_s0 = smov 64   ;;  %s741_s30 = scalar_lea.hbm %s4526_s5, %s2990_s8 }
  0x5f   : > { %s736_s1 = scalar_lea.vmem [#allocation6], %s4116_s6  ;;  %s742_s26 = sshll.u32 %s741_s30, 4  ;;  %s743_s26 = int_to_ptr.hbm [resolvable:$true] %s742_s26 }
  0x60   : > { %s783_s4 = scalar_lea.hbm %s4446_s7, %s4047_s15  ;;  %s4528_s30 = smov 1  }
  0x61   : > { %s784_s23 = sshll.u32 %s783_s4, 4  ;;  %s4530_s5 = scalar_lea.sflag [#allocation8], %s4038_s13  ;;  %s785_s23 = int_to_ptr.hbm [resolvable:$true] %s784_s23 }
  0x62   : > { %s698_s20 = scalar_lea.hbm %s4523_s29, %s2990_s8  ;;  %s744_s29 = sshll.u32 %s736_s1, 4  ;;  %s745_s29 = int_to_ptr.vmem [resolvable:$true] %s744_s29 }
  0x63   : > { %s699_s17 = sshll.u32 %s698_s20, 4  ;;  %s4527_s20 = scalar_lea.sflag [#allocation5], %s4038_s13  ;;  %s700_s17 = int_to_ptr.hbm [resolvable:$true] %s699_s17 }
  0x64   : > { %3129 = dma.hbm_to_vmem [thread:$0]  (!%p4016_p12), %s700_s17, 2048, %s702_s24, %s690_s19, %s4525_s0, %s4525_s0, %s4524_s25  }
  0x65   : > { %3135 = dma.hbm_to_vmem [thread:$0]  (!%p4016_p12), %s743_s26, 2048, %s745_s29, %s4527_s20, %s4525_s0, %s4525_s0, %s4524_s25  }
  0x66   : > { %s779_s17 = scalar_lea.vmem [#allocation9], %s4041_s21  ;;  %s4529_s1 = smov 16  }
  0x67   : > { %s786_s19 = sshll.u32 %s779_s17, 4  ;;  %s826_s26 = scalar_lea.hbm %s4448_s9, %s2990_s8  ;;  %s787_s19 = int_to_ptr.vmem [resolvable:$true] %s786_s19 }
  0x68   : > { %3141 = dma.hbm_to_vmem [thread:$0]  (!%p4016_p12), %s785_s23, 32, %s787_s19, %s4530_s5, %s4529_s1, %s4529_s1, %s4528_s30  }
  0x69   : > { %s821_s29 = scalar_lea.vmem [#allocation12], %s4116_s6  ;;  %s827_s21 = sshll.u32 %s826_s26, 4  ;;  %s828_s21 = int_to_ptr.hbm [resolvable:$true] %s827_s21 }
  0x6a   : > { %s829_s15 = sshll.u32 %s821_s29, 4  ;;  %s2610_s20 = sshll.u32 %s4035_s28, 6  ;;  %s830_s15 = int_to_ptr.vmem [resolvable:$true] %s829_s15 }
  0x6b   : > { %s4531_s2 = scalar_lea.sflag [#allocation11], %s4038_s13  ;;  %s2993_s5 = sshll.u32 %s3811_s3, 6 }
  0x6c   : > { %3147 = dma.hbm_to_vmem [thread:$0]  (!%p4016_p12), %s828_s21, 2048, %s830_s15, %s4531_s2, %s4525_s0, %s4525_s0, %s4524_s25  }
  0x6d   : > { %s865_s8 = scalar_lea.hbm %s4450_s11, %s2993_s5  ;;  %s860_s6 = scalar_lea.vmem [#allocation15], %s2610_s20 }
  0x6e   : > { %s868_s24 = sshll.u32 %s860_s6, 4  ;;  %s866_s4 = sshll.u32 %s865_s8, 4  ;;  %s869_s24 = int_to_ptr.vmem [resolvable:$true] %s868_s24  ;;  %s867_s4 = int_to_ptr.hbm [resolvable:$true] %s866_s4 }
  0x6f   : > { %s4532_s17 = scalar_lea.sflag [#allocation14], %s4038_s13  ;;  %s884_s30 = scalar_lea.hbm %s4451_s12, %s3811_s3 }
  0x70   : > { %3153 = dma.hbm_to_vmem [thread:$0]  (!%p4016_p12), %s867_s4, 1024, %s869_s24, %s4532_s17, %s4525_s0, %s4525_s0, %s4524_s25  }
  0x71   : > { %s886_s1 = sshll.u32 %s884_s30, 4  ;;  %s881_s26 = scalar_lea.vmem [#allocation16], %s4035_s28  ;;  %s887_s1 = int_to_ptr.hbm [resolvable:$true] %s886_s1 }
  0x72   : > { %s888_s29 = sshll.u32 %s881_s26, 4  ;;  %s879_s15 = scalar_lea.sflag [#allocation17], %s4038_s13  ;;  %s889_s29 = int_to_ptr.vmem [resolvable:$true] %s888_s29 }
  0x73   : > { %3156 = dma.hbm_to_vmem [thread:$0]  (!%p4016_p12), %s887_s1, 16, %s889_s29, %s879_s15  }
  0x74   : > { %897 = sbr.rel (%p3998_p8) target bundleno = 1882 (0x75a), region = 96  ;;  %s4188_s20 = sand.u32 (!%p3998_p8), 1, %s3791_s22  }
  0x75   : > { %s2614_s25 = sshll.u32 (!%p3998_p8), %s4188_s20, 7  ;;  %s900_s0 = scalar_lea.sflag (!%p3998_p8), [#allocation3], %s4188_s20 }
  0x76   : > { %s4192_s2 = scalar_lea.vmem (!%p3998_p8), [#allocation2], %s2614_s25 }
  0x79   : > { %3750 = dma.done.wait (%p3990_p6), %s900_s0, 2048  }
  0x7a   : > { %3752 = vsyncadd (%p3990_p6), %s900_s0, 4294965248  ;;  %s4534_s14 = sld [smem:[#allocation38_spill]]  ;;  %s4201_s13 = sshll.u32 %s4188_s20, 1 }
  0x7b   : > { %s913_s10 = scalar_lea.vmem [#allocation4], %s4201_s13 }
  0x80   : > { %s4535_s28 = sadd.s32 4294967295, %s4534_s14  }
  0x81   : > { %s909_s27 = sand.u32 1, %s4535_s28  }
  0x82   : > { %s910_s5 = scalar_lea.sflag [#allocation5], %s909_s27 }
  0x83   : > { %3754 = dma.done.wait (%p3990_p6), %s910_s5, 2080  }
  0x84   : > { %3756 = vsyncadd (%p3990_p6), %s910_s5, 4294965216  ;;  %s4208_s16 = scalar_lea.vmem [#allocation6], %s2614_s25  ;;  %s930_s8 = scalar_lea.sflag [#allocation8], %s909_s27 }
  0x85   : > { %s933_s6 = scalar_lea.vmem [#allocation7], %s4201_s13 }
  0x86   : > { %3758 = dma.done.wait (%p3990_p6), %s930_s8, 64  }
  0x87   : > { %3760 = vsyncadd (%p3990_p6), %s930_s8, 4294967232  ;;  %s943_s24 = scalar_lea.vmem [#allocation9], %s4201_s13  ;;  %s950_s4 = scalar_lea.sflag [#allocation11], %s909_s27 }
  0x88   : > { %s953_s17 = scalar_lea.vmem [#allocation10], %s4201_s13 }
  0x89   : > { %3762 = dma.done.wait (%p3990_p6), %s950_s4, 2080  }
  0x8a   : > { %3764 = vsyncadd (%p3990_p6), %s950_s4, 4294965216  ;;  %s4221_s19 = scalar_lea.vmem [#allocation12], %s2614_s25  ;;  %s970_s23 = scalar_lea.sflag [#allocation14], %s909_s27 }
  0x8b   : > { %s972_s30 = scalar_lea.vmem [#allocation13], %s4188_s20 }
  0x8c   : > { %3766 = dma.done.wait (%p3990_p6), %s970_s23, 1040  }
  0x8d   : > { %3768 = vsyncadd (%p3990_p6), %s970_s23, 4294966256  ;;  %s2621_s1 = sshll.u32 %s4188_s20, 6  ;;  %s989_s29 = scalar_lea.sflag [#allocation17], %s909_s27 }
  0x8e   : > { %s4229_s26 = scalar_lea.vmem [#allocation15], %s2621_s1  ;;  %s991_s15 = scalar_lea.vmem [#allocation16], %s4188_s20 }
  0x8f   : > { %3770 = dma.done.wait (%p3990_p6), %s989_s29, 16  }
  0x90   : > { %3772 = vsyncadd (%p3990_p6), %s989_s29, 4294967280 }
  0x91   : > { %3774 = dma.done.wait (%p3979_p3), [#allocation17], 16  }
  0x92   : > { %3776 = vsyncadd (%p3979_p3), [#allocation17], 4294967280 }
  0x93   : > { %3778 = dma.done.wait (%p3979_p3), [#allocation20], 32  }
  0x94   : > { %3780 = vsyncadd (%p3979_p3), [#allocation20], 4294967264 }
  0x95   : > { %3782 = dma.done.wait (%p3979_p3), [#allocation23], 1040  }
  0x96   : > { %3784 = vsyncadd (%p3979_p3), [#allocation23], 4294966256  ;;  %s4537_s21 = sld [smem:[#allocation35_spill]]  ;;  %vm1194_vm0 = vcmask 1045504   ;;  %v3005_v5 = vld [vmem:[%s4192_s2 + $0x38] sm:$0xff]  ;;  %vm1190_vm1 = vcmask 97280  }
  0x97   : > { %s4538_s27 = sld [smem:[#allocation45_spill]]  ;;  %1283 = vmatpush.bf16.msra.mxu1 %v3005_v5  ;;  %v3004_v8 = vld [vmem:[%s4192_s2 + $0x30] sm:$0xff]  ;;  %v3003_v9 = vld [vmem:[%s4192_s2 + $0x28] sm:$0xff]  ;;  %v3002_v10 = vld [vmem:[%s4192_s2 + $0x20] sm:$0xff]  ;;  %v3826_v41 = vmov 12.0   ;;  %vm1384_vm2 = vcmask 1043456  }
  0x98   : > { %s4539_s23 = sld [smem:[#allocation44_spill]]  ;;  %v3001_v11 = vld [vmem:[%s4192_s2 + $0x18] sm:$0xff]  ;;  %v3000_v12 = vld [vmem:[%s4192_s2 + $0x10] sm:$0xff]  ;;  %v2999_v13 = vld [vmem:[%s4192_s2 + $0x8] sm:$0xff]  ;;  %3257 = vrcp.f32 %v3826_v41  ;;  %vm2043_vm10 = vcmask 1042432  }
  0x99   : > { %v2998_v14 = vld [vmem:[%s4192_s2] sm:$0xff]  ;;  %v3012_v16 = vld [vmem:[%s4208_s16 + $0x30] sm:$0xff]  ;;  %v3011_v17 = vld [vmem:[%s4208_s16 + $0x28] sm:$0xff]  ;;  %s4540_s14 = sld [smem:[#allocation46_spill]] }
  0x9a   : > { %v3013_v15 = vld [vmem:[%s4208_s16 + $0x38] sm:$0xff]  ;;  %v3010_v18 = vld [vmem:[%s4208_s16 + $0x20] sm:$0xff]  ;;  %v3008_v29 = vld [vmem:[%s4208_s16 + $0x10] sm:$0xff]  ;;  %s4542_s8 = sld [smem:[#allocation36_spill]] }
  0x9b   : > { %1284 = vmatpush.bf16.msra.mxu1 %v3004_v8  ;;  %1368 = vmatpush.bf16.msra.mxu2 %v3013_v15  ;;  %v3009_v28 = vld [vmem:[%s4208_s16 + $0x18] sm:$0xff]  ;;  %v3007_v30 = vld [vmem:[%s4208_s16 + $0x8] sm:$0xff]  ;;  %v3006_v31 = vld [vmem:[%s4208_s16] sm:$0xff] }
  0x9c   : > { %p1142_p2 = scmp.lt.s32.totalorder %s4537_s21, 1  ;;  %v3243_v33 = vld [vmem:[%s913_s10] ss:$0 sm:$0xff]  ;;  %v3244_v42 = vld [vmem:[%s933_s6] ss:$0 sm:$0xff]  ;;  %v3019_v41 = vld [vmem:[%s4221_s19 + $0x28] sm:$0xff] }
  0x9e   : > { %s4562_s21 = smov (!%p1142_p2, %s4537_s21), 1  ;;  %v3258_v43 = vpop.eup %3257 }
  0x9f   : > { %s2994_s0 = sshll.u32 %s4562_s21, 3  ;;  %1285 = vmatpush.bf16.msra.mxu1 %v3003_v9  ;;  %1369 = vmatpush.bf16.msra.mxu2 %v3012_v16  ;;  %v1394_v47 = vmul.f32 12.0, %v3258_v43  ;;  %vm1398_vm3 = vweird.f32 %v3258_v43  ;;  %s2631_s29 = sshll.u32 %s4562_s21, 1 }
  0xa0   : > { %s4256_s5 = scalar_lea.vmem %s4538_s27, %s2994_s0  ;;  %s1146_s1 = scalar_lea.vmem %s4539_s23, %s2994_s0 }
  0xa1   : > { %v2642_v0 = vld [vmem:[%s4256_s5] sm:$0xf]  ;;  %v2997_v1 = vld [vmem:[%s4256_s5] sm:$0x30]  ;;  %v1395_v51 = vsub.f32 1.0, %v1394_v47  ;;  %s1155_s28 = scalar_lea.vmem %s4540_s14, %s2631_s29  ;;  %p1156_p3 = scmp.lt.s32.totalorder %s4542_s8, 1 }
  0xa2   : > { %v2638_v2 = vld [vmem:[%s1146_s1] sm:$0xf]  ;;  %v2643_v3 = vor.u32 %v2997_v1, %v2642_v0  ;;  %v2996_v4 = vld [vmem:[%s1146_s1] sm:$0x30] }
  0xa3   : > { %v4265_v7 = vor.u32 %v2996_v4, %v2638_v2  ;;  %1286 = vmatpush.bf16.msra.mxu1 %v3002_v10  ;;  %1370 = vmatpush.bf16.msra.mxu2 %v3011_v17  ;;  %v1176_v20 = vld [vmem:[%s4256_s5] sm:$0xf]  ;;  %v1177_v21 = vld [vmem:[%s4256_s5 + $0x4] sm:$0x3]  ;;  %v1396_v54 = vmul.f32 %v3258_v43, %v1395_v51  ;;  %v3014_v51 = vld [vmem:[%s4221_s19] sm:$0xff]  ;;  %s4564_s8 = smov (!%p1156_p3, %s4542_s8), 1 }
  0xa4   : > { %v1196_v6 = vsel %vm1194_vm0, %v2643_v3, 0  ;;  %v1178_v22 = vunpack.c.l.bf16 %v1176_v20  ;;  %v1179_v23 = vunpack.c.l.bf16 %v1177_v21  ;;  %v3245_v20 = vld [vmem:[%s943_s24] ss:$0 sm:$0xff] }
  0xa5   : > { %1205 = vmatpush.bf16.msra.mxu0 %v1196_v6  ;;  %v1397_v57 = vadd.f32 %v3258_v43, %v1396_v54 }
  0xa7   : > { %1287 = vmatpush.bf16.msra.mxu1 %v3001_v11  ;;  %1371 = vmatpush.bf16.msra.mxu2 %v3010_v18  ;;  %v4291_v60 = vsel %vm1398_vm3, %v3258_v43, %v1397_v57  ;;  %v3017_v43 = vld [vmem:[%s4221_s19 + $0x18] sm:$0xff] }
  0xa8   : > { %2644 = vmatmul.msk.bf16.vlgmr.msra.gmra.mxu0 %vm1190_vm1, %v4265_v7 }
  0xab   : > { %1288 = vmatpush.bf16.msra.mxu1 %v3000_v12  ;;  %1372 = vmatpush.bf16.msra.mxu2 %v3009_v28 }
  0xaf   : > { %1289 = vmatpush.bf16.msra.mxu1 %v2999_v13  ;;  %1373 = vmatpush.bf16.msra.mxu2 %v3008_v29 }
  0xb3   : > { %1290 = vmatpush.bf16.msra.mxu1 %v2998_v14  ;;  %1374 = vmatpush.bf16.msra.mxu2 %v3007_v30  ;;  %v3029_v30 = vld [vmem:[%s4192_s2 + $0x78] sm:$0xff] }
  0xb7   : > { %1375 = vmatpush.bf16.msra.mxu2 %v3006_v31 }
 0x125   : > { %v1207_v19 = vpop.f32.mrf.mxu0 }
 0x126   : > { %v1212_v25 = vadd.f32 %v1207_v19, %v1178_v22 }
 0x12d   : > { %v1209_v24 = vpop.f32.mrf.mxu0 }
 0x12e   : > { %v1213_v26 = vadd.f32 %v1209_v24, %v1179_v23  ;;  %v3246_v24 = vld [vmem:[%s953_s17] ss:$0 sm:$0xff] }
 0x130   : > { %v1214_v27 = vpack.c.bf16 %v1213_v26, %v1212_v25 }
 0x132   : > { %1291 = vmatmul.bf16.vlgmr.msra.gmra.mxu1 %v1214_v27 }
 0x1af   : > { %v1292_v32 = vpop.f32.mrf.mxu1 }
 0x1b0   : > { %v1293_v34 = vadd.f32 %v3243_v33, %v1292_v32  ;;  %v4306_v32 = vld [vmem:[%s1155_s28] sm:$0x3] }
 0x1b2   : > { %v1297_v37 = vmax.f32 %v1293_v34, 0.0  ;;  %v3027_v34 = vld [vmem:[%s4192_s2 + $0x68] sm:$0xff] }
 0x1b7   : > { %v1294_v35 = vpop.f32.mrf.mxu1 }
 0x1b8   : > { %v1295_v36 = vadd.f32 %v3243_v33, %v1294_v35  ;;  %v3028_v33 = vld [vmem:[%s4192_s2 + $0x70] sm:$0xff]  ;;  %v3026_v35 = vld [vmem:[%s4192_s2 + $0x60] sm:$0xff] }
 0x1ba   : > { %v1298_v38 = vmax.f32 %v1295_v36, 0.0  ;;  %v3025_v36 = vld [vmem:[%s4192_s2 + $0x58] sm:$0xff] }
 0x1bc   : > { %v1299_v39 = vpack.c.bf16 %v1298_v38, %v1297_v37  ;;  %v3024_v37 = vld [vmem:[%s4192_s2 + $0x50] sm:$0xff]  ;;  %v3023_v38 = vld [vmem:[%s4192_s2 + $0x48] sm:$0xff] }
 0x1be   : > { %1376 = vmatmul.bf16.vlgmr.msra.gmra.mxu2 %v1299_v39  ;;  %v3021_v39 = vld [vmem:[%s4221_s19 + $0x38] sm:$0xff] }
 0x241   : > { %v1377_v40 = vpop.f32.mrf.mxu2 }
 0x242   : > { %v1378_v44 = vadd.f32 %v3244_v42, %v1377_v40  ;;  %v3020_v40 = vld [vmem:[%s4221_s19 + $0x30] sm:$0xff] }
 0x244   : > { %v1382_v49 = vmax.f32 %v1378_v44, 0.0  ;;  %v3037_v44 = vld [vmem:[%s4208_s16 + $0x78] sm:$0xff] }
 0x249   : > { %v1379_v45 = vpop.f32.mrf.mxu2 }
 0x24a   : > { %v1380_v46 = vadd.f32 %v3244_v42, %v1379_v45  ;;  %v3018_v42 = vld [vmem:[%s4221_s19 + $0x20] sm:$0xff]  ;;  %v3016_v45 = vld [vmem:[%s4221_s19 + $0x10] sm:$0xff] }
 0x24c   : > { %v1383_v48 = vmax.f32 %v1380_v46, 0.0  ;;  %v3036_v46 = vld [vmem:[%s4208_s16 + $0x70] sm:$0xff] }
 0x24e   : > { %v1385_v50 = vsel %vm1384_vm2, %v1383_v48, 0.0 }
 0x24f   : > { %v1386_v52 = vadd.f32 %v1385_v50, %v1382_v49 }
 0x251   : > { %v1387_v53 = vrot.slane %v1386_v52, 4 }
 0x253   : > { %v1388_v55 = vadd.f32 %v1387_v53, %v1386_v52  ;;  %v3034_v52 = vld [vmem:[%s4208_s16 + $0x60] sm:$0xff] }
 0x255   : > { %v1389_v56 = vrot.slane %v1388_v55, 2 }
 0x257   : > { %v1390_v58 = vadd.f32 %v1389_v56, %v1388_v55 }
 0x259   : > { %v1391_v59 = vrot.slane %v1390_v58, 1 }
 0x25b   : > { %v1392_v61 = vadd.f32 %v1391_v59, %v1390_v58  ;;  %v3033_v59 = vld [vmem:[%s4208_s16 + $0x58] sm:$0xff] }
 0x25d   : > { %v1400_v62 = vmul.f32 %v4291_v60, %v1392_v61  ;;  %v3032_v61 = vld [vmem:[%s4208_s16 + $0x50] sm:$0xff] }
 0x25f   : > { %v1401_v63 = vsub.f32 %v1382_v49, %v1400_v62  ;;  %v1402_v0 = vsub.f32 %v1383_v48, %v1400_v62  ;;  %v3015_v48 = vld [vmem:[%s4221_s19 + $0x8] sm:$0xff]  ;;  %v3035_v49 = vld [vmem:[%s4208_s16 + $0x68] sm:$0xff] }
 0x260   : > { %v3031_v62 = vld [vmem:[%s4208_s16 + $0x48] sm:$0xff] }
 0x261   : > { %v1403_v1 = vmul.f32 %v1401_v63, %v1401_v63  ;;  %v1404_v2 = vmul.f32 %v1402_v0, %v1402_v0 }
 0x263   : > { %v1405_v3 = vsel %vm1384_vm2, %v1404_v2, 0.0 }
 0x264   : > { %v1406_v4 = vadd.f32 %v1405_v3, %v1403_v1  ;;  %v3247_v1 = vld [vmem:[%s913_s10 + $0x1] ss:$0 sm:$0xff]  ;;  %s4541_s10 = sld [smem:[#allocation53_spill]] }
 0x266   : > { %v1407_v5 = vrot.slane %v1406_v4, 4 }
 0x268   : > { %v1408_v6 = vadd.f32 %v1407_v5, %v1406_v4 }
 0x26a   : > { %v1409_v8 = vrot.slane %v1408_v6, 2 }
 0x26c   : > { %v1410_v9 = vadd.f32 %v1409_v8, %v1408_v6 }
 0x26e   : > { %v1411_v10 = vrot.slane %v1410_v9, 1 }
 0x270   : > { %v1412_v11 = vadd.f32 %v1411_v10, %v1410_v9 }
 0x272   : > { %v1413_v12 = vmul.f32 %v1412_v11, %v4291_v60 }
 0x274   : > { %v1414_v13 = vadd.f32 1e-05, %v1413_v12  ;;  %v3248_v12 = vld [vmem:[%s933_s6 + $0x1] ss:$0 sm:$0xff] }
 0x276   : > { %3259 = vrsqrt.f32 %v1414_v13  ;;  %vm1421_vm5 = vweird.f32 %v1414_v13 }
 0x27c   : > { %v3260_v14 = vpop.eup %3259 }
 0x27d   : > { %v1416_v15 = vmul.f32 %v3260_v14, %v1414_v13  ;;  %vm1422_vm4 = vweird.f32 %v3260_v14 }
 0x27e   : > { %vm1423_vm6 = vmor %vm1421_vm5, %vm1422_vm4 }
 0x27f   : > { %v1417_v16 = vmul.f32 %v3260_v14, %v1416_v15 }
 0x281   : > { %v1418_v17 = vmul.f32 0.5, %v1417_v16 }
 0x283   : > { %v1419_v18 = vsub.f32 1.5, %v1418_v17 }
 0x285   : > { %v1420_v19 = vmul.f32 %v3260_v14, %v1419_v18 }
 0x287   : > { %v1424_v21 = vsel %vm1423_vm6, %v3260_v14, %v1420_v19 }
 0x288   : > { %v1425_v22 = vmul.f32 %v1424_v21, %v1401_v63  ;;  %v1426_v23 = vmul.f32 %v1424_v21, %v1402_v0  ;;  %v3030_v63 = vld [vmem:[%s4208_s16 + $0x40] sm:$0xff]  ;;  %s4543_s16 = sld [smem:[#allocation58_spill]] }
 0x28a   : > { %v1431_v25 = vmul.f32 %v3245_v20, %v1425_v22  ;;  %v1432_v26 = vmul.f32 %v3245_v20, %v1426_v23 }
 0x28c   : > { %v1437_v27 = vadd.f32 %v3246_v24, %v1431_v25  ;;  %v1438_v28 = vadd.f32 %v3246_v24, %v1432_v26 }
 0x28e   : > { %v1439_v29 = vpack.c.bf16 %v1438_v28, %v1437_v27 }
 0x290   : > { %v1444_v31 = vsel %vm1194_vm0, %v1439_v29, 0 }
 0x291   : > { %1453 = vmatpush.bf16.msra.mxu3 %v1444_v31  ;;  %1483 = vmatpush.bf16.msrb.mxu0 %v1444_v31 }
 0x294   : > { %2710 = vmatmul.msk.bf16.vlgmr.msrb.gmra.mxu0 %vm1190_vm1, %v4265_v7  ;;  %2709 = vmatmul.msk.bf16.vlgmr.msra.gmra.mxu3 %vm1190_vm1, %v4306_v32  ;;  %v3022_v7 = vld [vmem:[%s4192_s2 + $0x40] sm:$0xff] }
 0x295   : > { %1563 = vmatpush.bf16.msrb.mxu3 %v3029_v30  ;;  %1650 = vmatpush.bf16.msra.mxu0 %v3037_v44 }
 0x299   : > { %1564 = vmatpush.bf16.msrb.mxu3 %v3028_v33  ;;  %1651 = vmatpush.bf16.msra.mxu0 %v3036_v46  ;;  %v3042_v46 = vld [vmem:[%s4221_s19 + $0x60] sm:$0xff] }
 0x29d   : > { %1565 = vmatpush.bf16.msrb.mxu3 %v3027_v34  ;;  %1652 = vmatpush.bf16.msra.mxu0 %v3035_v49  ;;  %v3041_v49 = vld [vmem:[%s4221_s19 + $0x58] sm:$0xff] }
 0x2a1   : > { %1566 = vmatpush.bf16.msrb.mxu3 %v3026_v35  ;;  %1653 = vmatpush.bf16.msra.mxu0 %v3034_v52  ;;  %v3040_v52 = vld [vmem:[%s4221_s19 + $0x50] sm:$0xff] }
 0x2a5   : > { %1567 = vmatpush.bf16.msrb.mxu3 %v3025_v36  ;;  %1654 = vmatpush.bf16.msra.mxu0 %v3033_v59  ;;  %v3039_v59 = vld [vmem:[%s4221_s19 + $0x48] sm:$0xff] }
 0x2a9   : > { %1568 = vmatpush.bf16.msrb.mxu3 %v3024_v37  ;;  %1655 = vmatpush.bf16.msra.mxu0 %v3032_v61 }
 0x2ad   : > { %1569 = vmatpush.bf16.msrb.mxu3 %v3023_v38  ;;  %1656 = vmatpush.bf16.msra.mxu0 %v3031_v62 }
 0x2b1   : > { %1570 = vmatpush.bf16.msrb.mxu3 %v3022_v7  ;;  %1657 = vmatpush.bf16.msra.mxu0 %v3030_v63 }
 0x2b5   : > { %1859 = vmatpush.bf16.msra.mxu3 %v3021_v39 }
 0x2b9   : > { %1860 = vmatpush.bf16.msra.mxu3 %v3020_v40 }
 0x2bd   : > { %1861 = vmatpush.bf16.msra.mxu3 %v3019_v41  ;;  %v3045_v41 = vld [vmem:[%s4221_s19 + $0x78] sm:$0xff] }
 0x2be   : > { %1798 = vmatpush.bf16.msrb.mxu2 %v3045_v41 }
 0x2c1   : > { %1862 = vmatpush.bf16.msra.mxu3 %v3018_v42  ;;  %v3044_v42 = vld [vmem:[%s4221_s19 + $0x70] sm:$0xff] }
 0x2c2   : > { %1799 = vmatpush.bf16.msrb.mxu2 %v3044_v42 }
 0x2c5   : > { %1863 = vmatpush.bf16.msra.mxu3 %v3017_v43  ;;  %v3043_v43 = vld [vmem:[%s4221_s19 + $0x68] sm:$0xff] }
 0x2c6   : > { %1800 = vmatpush.bf16.msrb.mxu2 %v3043_v43 }
 0x2c9   : > { %1864 = vmatpush.bf16.msra.mxu3 %v3016_v45 }
 0x2ca   : > { %1801 = vmatpush.bf16.msrb.mxu2 %v3042_v46 }
 0x2cd   : > { %1865 = vmatpush.bf16.msra.mxu3 %v3015_v48 }
 0x2ce   : > { %1802 = vmatpush.bf16.msrb.mxu2 %v3041_v49 }
 0x2d1   : > { %1866 = vmatpush.bf16.msra.mxu3 %v3014_v51  ;;  %v3249_v51 = vld [vmem:[%s943_s24 + $0x1] ss:$0 sm:$0xff] }
 0x2d2   : > { %1803 = vmatpush.bf16.msrb.mxu2 %v3040_v52 }
 0x2d6   : > { %1804 = vmatpush.bf16.msrb.mxu2 %v3039_v59  ;;  %v3064_v59 = vld [vmem:[#allocation22 + $0x10] sm:$0xff] }
 0x311   : > { %v1485_v47 = vpop.f32.mrf.mxu0 }
 0x312   : > { %v1490_v54 = vadd.f32 %v1485_v47, %v1437_v27 }
 0x317   : > { %v1455_v50 = vpop.f32.mrf.mxu3 }
 0x318   : > { %v1459_v58 = vpack.c.bf16 %v1455_v50, %v1455_v50 }
 0x319   : > { %v1487_v53 = vpop.f32.mrf.mxu0 }
 0x31a   : > { %v1491_v55 = vadd.f32 %v1487_v53, %v1438_v28 }
 0x31c   : > { %v1492_v56 = vpack.c.bf16 %v1491_v55, %v1490_v54 }
 0x31e   : > { %1571 = vmatmul.bf16.vlgmr.msrb.gmra.mxu3 %v1492_v56  ;;  %v3250_v56 = vld [vmem:[%s953_s17 + $0x1] ss:$0 sm:$0xff] }
 0x31f   : > { %v1457_v57 = vpop.f32.mrf.mxu3 }
 0x32e   : > { %1867 = vmatmul.bf16.vlgmr.msra.gmra.mxu3 %v1459_v58 }
 0x3a1   : > { %v1572_v0 = vpop.f32.mrf.mxu3 }
 0x3a2   : > { %v1573_v2 = vadd.f32 %v3247_v1, %v1572_v0 }
 0x3a4   : > { %v1577_v5 = vmax.f32 %v1573_v2, 0.0  ;;  %v3053_v2 = vld [vmem:[%s4229_s26 + $0x38] sm:$0xff] }
 0x3a9   : > { %v1574_v3 = vpop.f32.mrf.mxu3 }
 0x3aa   : > { %v1575_v4 = vadd.f32 %v3247_v1, %v1574_v3  ;;  %v3038_v1 = vld [vmem:[%s4221_s19 + $0x40] sm:$0xff]  ;;  %v3052_v3 = vld [vmem:[%s4229_s26 + $0x30] sm:$0xff] }
 0x3ab   : > { %1805 = vmatpush.bf16.msrb.mxu2 %v3038_v1  ;;  %v3062_v1 = vld [vmem:[#allocation22] sm:$0xff] }
 0x3ac   : > { %v1578_v6 = vmax.f32 %v1575_v4, 0.0  ;;  %v3051_v4 = vld [vmem:[%s4229_s26 + $0x28] sm:$0xff] }
 0x3ae   : > { %v1579_v8 = vpack.c.bf16 %v1578_v6, %v1577_v5  ;;  %v3050_v5 = vld [vmem:[%s4229_s26 + $0x20] sm:$0xff]  ;;  %v3049_v6 = vld [vmem:[%s4229_s26 + $0x18] sm:$0xff] }
 0x3b0   : > { %1658 = vmatmul.bf16.vlgmr.msra.gmra.mxu0 %v1579_v8  ;;  %v3048_v8 = vld [vmem:[%s4229_s26 + $0x10] sm:$0xff] }
 0x3b1   : > { %v4337_v9 = vpop.f32.mrf.mxu3 }
 0x3b9   : > { %v1870_v10 = vpop.f32.mrf.mxu3 }
 0x42d   : > { %v1659_v11 = vpop.f32.mrf.mxu0 }
 0x42e   : > { %v1660_v13 = vadd.f32 %v3248_v12, %v1659_v11 }
 0x430   : > { %v1664_v17 = vmax.f32 %v1660_v13, 0.0  ;;  %v3046_v13 = vld [vmem:[%s4229_s26] sm:$0xff] }
 0x435   : > { %v1661_v14 = vpop.f32.mrf.mxu0 }
 0x436   : > { %v1662_v15 = vadd.f32 %v3248_v12, %v1661_v14  ;;  %v3047_v12 = vld [vmem:[%s4229_s26 + $0x8] sm:$0xff] }
 0x437   : > { %v3061_v14 = vld [vmem:[%s4541_s10 + $0x38] sm:$0xff] }
 0x438   : > { %v1665_v16 = vmax.f32 %v1662_v15, 0.0  ;;  %2030 = vmatpush.bf16.msrb.mxu0 %v3061_v14  ;;  %v3060_v15 = vld [vmem:[%s4541_s10 + $0x30] sm:$0xff] }
 0x439   : > { %v3254_v14 = vld [vmem:[#allocation19] ss:$0 sm:$0xff] }
 0x43a   : > { %v1666_v18 = vsel %vm1384_vm2, %v1665_v16, 0.0 }
 0x43b   : > { %v1667_v19 = vadd.f32 %v1666_v18, %v1664_v17  ;;  %v3057_v18 = vld [vmem:[%s4541_s10 + $0x18] sm:$0xff] }
 0x43c   : > { %2031 = vmatpush.bf16.msrb.mxu0 %v3060_v15 }
 0x43d   : > { %v1668_v20 = vrot.slane %v1667_v19, 4 }
 0x43f   : > { %v1669_v21 = vadd.f32 %v1668_v20, %v1667_v19  ;;  %v3056_v19 = vld [vmem:[%s4541_s10 + $0x10] sm:$0xff]  ;;  %v3251_v20 = vld [vmem:[%s972_s30] ss:$0 sm:$0xff]  ;;  %s2632_s30 = sshll.u32 %s4564_s8, 1 }
 0x440   : > { %s4398_s14 = sadd.s32 %s2632_s30, %s4562_s21  ;;  %s4544_s21 = sld [smem:[#allocation59_spill]] }
 0x441   : > { %v1670_v22 = vrot.slane %v1669_v21, 2  ;;  %s2633_s28 = sshll.u32 %s4398_s14, 2 }
 0x442   : > { %s1163_s6 = scalar_lea.vmem %s4543_s16, %s2633_s28 }
 0x443   : > { %v1671_v23 = vadd.f32 %v1670_v22, %v1669_v21  ;;  %v3055_v21 = vld [vmem:[%s4541_s10 + $0x8] sm:$0xff] }
 0x445   : > { %v1672_v24 = vrot.slane %v1671_v23, 1 }
 0x446   : > { %s1171_s24 = scalar_lea.vmem %s4544_s21, %s2633_s28 }
 0x447   : > { %v1673_v25 = vadd.f32 %v1672_v24, %v1671_v23 }
 0x449   : > { %v1674_v26 = vmul.f32 %v1673_v25, %v4291_v60 }
 0x44b   : > { %v1675_v27 = vsub.f32 %v1664_v17, %v1674_v26  ;;  %v1676_v28 = vsub.f32 %v1665_v16, %v1674_v26  ;;  %v3059_v16 = vld [vmem:[%s4541_s10 + $0x28] sm:$0xff]  ;;  %v3058_v17 = vld [vmem:[%s4541_s10 + $0x20] sm:$0xff] }
 0x44c   : > { %2032 = vmatpush.bf16.msrb.mxu0 %v3059_v16 }
 0x44d   : > { %v1677_v29 = vmul.f32 %v1675_v27, %v1675_v27  ;;  %v1678_v30 = vmul.f32 %v1676_v28, %v1676_v28 }
 0x44f   : > { %v1679_v31 = vsel %vm1384_vm2, %v1678_v30, 0.0 }
 0x450   : > { %v1680_v33 = vadd.f32 %v1679_v31, %v1677_v29  ;;  %2033 = vmatpush.bf16.msrb.mxu0 %v3058_v17  ;;  %v3255_v17 = vld [vmem:[#allocation21] ss:$0 sm:$0xff] }
 0x452   : > { %v1681_v34 = vrot.slane %v1680_v33, 4 }
 0x454   : > { %v1682_v35 = vadd.f32 %v1681_v34, %v1680_v33  ;;  %2034 = vmatpush.bf16.msrb.mxu0 %v3057_v18  ;;  %v3827_v34 = vmov 3.0  }
 0x456   : > { %v1683_v36 = vrot.slane %v1682_v35, 2 }
 0x458   : > { %v1684_v37 = vadd.f32 %v1683_v36, %v1682_v35  ;;  %2035 = vmatpush.bf16.msrb.mxu0 %v3056_v19  ;;  %v3253_v36 = vld [vmem:[#allocation18] ss:$0 sm:$0xff] }
 0x45a   : > { %v1685_v38 = vrot.slane %v1684_v37, 1 }
 0x45c   : > { %v1686_v7 = vadd.f32 %v1685_v38, %v1684_v37  ;;  %2036 = vmatpush.bf16.msrb.mxu0 %v3055_v21 }
 0x45e   : > { %v1687_v39 = vmul.f32 %v1686_v7, %v4291_v60 }
 0x460   : > { %v1688_v40 = vadd.f32 1e-05, %v1687_v39 }
 0x462   : > { %3261 = vrsqrt.f32 %v1688_v40  ;;  %vm1695_vm8 = vweird.f32 %v1688_v40 }
 0x463   : > { %3263 = vrcp.f32 %v3827_v34 }
 0x468   : > { %v3262_v44 = vpop.eup %3261 }
 0x469   : > { %v1690_v45 = vmul.f32 %v3262_v44, %v1688_v40  ;;  %vm1696_vm7 = vweird.f32 %v3262_v44  ;;  %v3264_v35 = vpop.eup %3263  ;;  %v3069_v40 = vld [vmem:[#allocation22 + $0x38] sm:$0xff] }
 0x46a   : > { %vm1697_vm9 = vmor %vm1695_vm8, %vm1696_vm7  ;;  %v2052_v37 = vmul.f32 3.0, %v3264_v35  ;;  %2161 = vmatpush.bf16.msra.mxu2 %v3069_v40  ;;  %vm2056_vm11 = vweird.f32 %v3264_v35 }
 0x46b   : > { %v1691_v47 = vmul.f32 %v3262_v44, %v1690_v45  ;;  %v3068_v45 = vld [vmem:[#allocation22 + $0x30] sm:$0xff] }
 0x46c   : > { %v2053_v39 = vsub.f32 1.0, %v2052_v37 }
 0x46d   : > { %v1692_v48 = vmul.f32 0.5, %v1691_v47 }
 0x46e   : > { %v2054_v43 = vmul.f32 %v3264_v35, %v2053_v39  ;;  %2162 = vmatpush.bf16.msra.mxu2 %v3068_v45 }
 0x46f   : > { %v1693_v60 = vsub.f32 1.5, %v1692_v48 }
 0x470   : > { %v2055_v48 = vadd.f32 %v3264_v35, %v2054_v43 }
 0x471   : > { %v1694_v50 = vmul.f32 %v3262_v44, %v1693_v60  ;;  %v3067_v60 = vld [vmem:[#allocation22 + $0x28] sm:$0xff] }
 0x472   : > { %2163 = vmatpush.bf16.msra.mxu2 %v3067_v60 }
 0x473   : > { %v1698_v53 = vsel %vm1697_vm9, %v3262_v44, %v1694_v50 }
 0x474   : > { %v1699_v54 = vmul.f32 %v1698_v53, %v1675_v27  ;;  %v1700_v55 = vmul.f32 %v1698_v53, %v1676_v28  ;;  %v3054_v28 = vld [vmem:[%s4541_s10] sm:$0xff] }
 0x475   : > { %2037 = vmatpush.bf16.msrb.mxu0 %v3054_v28  ;;  %v3066_v53 = vld [vmem:[#allocation22 + $0x20] sm:$0xff] }
 0x476   : > { %v1706_v57 = vmul.f32 %v3249_v51, %v1699_v54  ;;  %v1707_v58 = vmul.f32 %v3249_v51, %v1700_v55  ;;  %v2057_v51 = vsel %vm2056_vm11, %v3264_v35, %v2055_v48  ;;  %2164 = vmatpush.bf16.msra.mxu2 %v3066_v53 }
 0x478   : > { %v1713_v61 = vadd.f32 %v3250_v56, %v1706_v57  ;;  %v1714_v62 = vadd.f32 %v3250_v56, %v1707_v58  ;;  %v3065_v56 = vld [vmem:[#allocation22 + $0x18] sm:$0xff] }
 0x47a   : > { %v1715_v63 = vpack.c.bf16 %v1714_v62, %v1713_v61  ;;  %2165 = vmatpush.bf16.msra.mxu2 %v3065_v56 }
 0x47c   : > { %v1717_v0 = vsel %vm1194_vm0, %v1715_v63, 0  ;;  %v3063_v63 = vld [vmem:[#allocation22 + $0x8] sm:$0xff] }
 0x47d   : > { %1726 = vmatpush.bf16.msrb.mxu1 %v1717_v0 }
 0x47e   : > { %2166 = vmatpush.bf16.msra.mxu2 %v3064_v59 }
 0x480   : > { %2811 = vmatmul.msk.bf16.vlgmr.msrb.gmra.mxu1 %vm1190_vm1, %v4306_v32 }
 0x481   : > { %1947 = vmatpush.bf16.msra.mxu1 %v3053_v2 }
 0x482   : > { %2167 = vmatpush.bf16.msra.mxu2 %v3063_v63 }
 0x485   : > { %1948 = vmatpush.bf16.msra.mxu1 %v3052_v3 }
 0x486   : > { %2168 = vmatpush.bf16.msra.mxu2 %v3062_v1 }
 0x489   : > { %1949 = vmatpush.bf16.msra.mxu1 %v3051_v4 }
 0x48d   : > { %1950 = vmatpush.bf16.msra.mxu1 %v3050_v5 }
 0x491   : > { %1951 = vmatpush.bf16.msra.mxu1 %v3049_v6 }
 0x495   : > { %1952 = vmatpush.bf16.msra.mxu1 %v3048_v8 }
 0x499   : > { %1953 = vmatpush.bf16.msra.mxu1 %v3047_v12 }
 0x49d   : > { %1954 = vmatpush.bf16.msra.mxu1 %v3046_v13 }
 0x4fd   : > { %v1728_v10 = vpop.f32.mrf.mxu1 }
 0x4fe   : > { %v1732_v11 = vpack.c.bf16 %v1728_v10, %v1728_v10 }
 0x500   : > { %1806 = vmatmul.bf16.vlgmr.msrb.gmra.mxu2 %v1732_v11 }
 0x505   : > { %v1730_v32 = vpop.f32.mrf.mxu1 }
 0x583   : > { %v1807_v22 = vpop.f32.mrf.mxu2 }
 0x584   : > { %v1869_v23 = vadd.f32 %v4337_v9, %v1807_v22  ;;  %v3252_v9 = vld [vmem:[%s991_s15] ss:$0 sm:$0xff]  ;;  %v3256_v22 = vld [vmem:[#allocation24] ss:$0 sm:$0xff] }
 0x586   : > { %v1876_v24 = vadd.f32 %v3251_v20, %v1869_v23 }
 0x588   : > { %v1877_v25 = vmax.f32 %v1876_v24, 0.0 }
 0x58a   : > { %v1878_v26 = vpack.c.bf16 %v1877_v25, %v1877_v25 }
 0x58b   : > { %v1809_v27 = vpop.f32.mrf.mxu2 }
 0x58c   : > { %1955 = vmatmul.bf16.vlgmr.msra.gmra.mxu1 %v1878_v26 }
 0x609   : > { %v1956_v29 = vpop.f32.mrf.mxu1 }
 0x60a   : > { %v1957_v30 = vadd.f32 %v3252_v9, %v1956_v29 }
 0x60c   : > { %1960 = vst [vmem:[%s1163_s6] sm:$0x7] %v1957_v30  ;;  %v1961_v31 = vpack.c.bf16 %v1957_v30, %v1957_v30 }
 0x60e   : > { %2038 = vmatmul.bf16.vlgmr.msrb.gmra.mxu0 %v1961_v31 }
 0x611   : > { %v1958_v33 = vpop.f32.mrf.mxu1 }
 0x68b   : > { %v2039_v38 = vpop.f32.mrf.mxu0 }
 0x68c   : > { %v2040_v7 = vadd.f32 %v3253_v36, %v2039_v38 }
 0x68e   : > { %v2044_v41 = vsel %vm2043_vm10, %v2040_v7, 0.0 }
 0x68f   : > { %v2045_v42 = vrot.slane %v2044_v41, 4 }
 0x691   : > { %v2046_v44 = vadd.f32 %v2045_v42, %v2044_v41 }
 0x693   : > { %v2047_v46 = vrot.slane %v2046_v44, 2  ;;  %v2041_v47 = vpop.f32.mrf.mxu0 }
 0x695   : > { %v2048_v49 = vadd.f32 %v2047_v46, %v2046_v44 }
 0x697   : > { %v2049_v50 = vrot.slane %v2048_v49, 1 }
 0x699   : > { %v2050_v52 = vadd.f32 %v2049_v50, %v2048_v49 }
 0x69b   : > { %v2058_v54 = vmul.f32 %v2057_v51, %v2050_v52 }
 0x69d   : > { %v2059_v55 = vsub.f32 %v2040_v7, %v2058_v54 }
 0x69f   : > { %v2060_v57 = vmul.f32 %v2059_v55, %v2059_v55 }
 0x6a1   : > { %v2061_v58 = vsel %vm2043_vm10, %v2060_v57, 0.0 }
 0x6a2   : > { %v2062_v61 = vrot.slane %v2061_v58, 4 }
 0x6a4   : > { %v2063_v62 = vadd.f32 %v2062_v61, %v2061_v58 }
 0x6a6   : > { %v2064_v0 = vrot.slane %v2063_v62, 2 }
 0x6a8   : > { %v2065_v2 = vadd.f32 %v2064_v0, %v2063_v62 }
 0x6aa   : > { %v2066_v3 = vrot.slane %v2065_v2, 1 }
 0x6ac   : > { %v2067_v4 = vadd.f32 %v2066_v3, %v2065_v2 }
 0x6ae   : > { %v2068_v5 = vmul.f32 %v2067_v4, %v2057_v51 }
 0x6b0   : > { %v2069_v6 = vadd.f32 1e-05, %v2068_v5 }
 0x6b2   : > { %3265 = vrsqrt.f32 %v2069_v6  ;;  %vm2076_vm13 = vweird.f32 %v2069_v6 }
 0x6b8   : > { %v3266_v8 = vpop.eup %3265 }
 0x6b9   : > { %v2071_v10 = vmul.f32 %v3266_v8, %v2069_v6  ;;  %vm2077_vm12 = vweird.f32 %v3266_v8 }
 0x6ba   : > { %vm2078_vm14 = vmor %vm2076_vm13, %vm2077_vm12 }
 0x6bb   : > { %v2072_v11 = vmul.f32 %v3266_v8, %v2071_v10 }
 0x6bd   : > { %v2073_v32 = vmul.f32 0.5, %v2072_v11 }
 0x6bf   : > { %v2074_v12 = vsub.f32 1.5, %v2073_v32 }
 0x6c1   : > { %v2075_v13 = vmul.f32 %v3266_v8, %v2074_v12 }
 0x6c3   : > { %v2079_v15 = vsel %vm2078_vm14, %v3266_v8, %v2075_v13 }
 0x6c4   : > { %v2080_v16 = vmul.f32 %v2079_v15, %v2059_v55 }
 0x6c6   : > { %v2085_v18 = vmul.f32 %v3254_v14, %v2080_v16 }
 0x6c8   : > { %v2090_v19 = vadd.f32 %v3255_v17, %v2085_v18 }
 0x6ca   : > { %v2091_v20 = vmax.f32 %v2090_v19, 0.0 }
 0x6cc   : > { %v2092_v21 = vpack.c.bf16 %v2091_v20, %v2091_v20 }
 0x6ce   : > { %2169 = vmatmul.bf16.vlgmr.msra.gmra.mxu2 %v2092_v21 }
 0x751   : > { %v2170_v23 = vpop.f32.mrf.mxu2 }
 0x752   : > { %v2171_v24 = vadd.f32 %v3256_v22, %v2170_v23 }
 0x754   : > { %2174 = vst [vmem:[%s1171_s24] sm:$0x7] %v2171_v24 }
 0x759   : > { %v2172_v25 = vpop.f32.mrf.mxu2 }
 0x75a PF: > { %s4545_s17 = sld [smem:[#allocation38_spill]]  ;;  %s4551_s1 = smov %s3791_s22 }
 0x75b   : > { %s4546_s19 = sld [smem:[#allocation34_spill]]  ;;  %s4553_s2 = smov %s3811_s3 }
 0x75c   : > { %s4547_s23 = sld [smem:[#allocation43_spill]] }
 0x75d   : > { %s4548_s24 = sld [smem:[#allocation37_spill]] }
 0x75e   : > { %s4549_s25 = sld [smem:[#allocation41_spill]] }
 0x75f   : > { %s4550_s27 = sld [smem:[#allocation42_spill]] }
 0x760   : > { %s51_s26 = sadd.s32 1, %s4545_s17  }
 0x761   : > { %p48_p4 = scmp.ge.s32.totalorder %s51_s26, 6   ;;  %s4552_s22 = smov %s4546_s19 }
 0x763   :  { %50 = sbr.rel (!%p48_p4) target bundleno = 34 (0x22), region = 293 }
 0x765   : > { %s4554_s3 = smov %s4550_s27 }
 0x768   :  { %2224 = vsyncpa [#allocation3], 1 }
 0x769   :  { %2226 = vsyncpa [#allocation3 + $0x1], 1 }
 0x76a   :  { %2227 = vsyncpa [#allocation5], 1 }
 0x76b   :  { %2229 = vsyncpa [#allocation5 + $0x1], 1 }
 0x76c   :  { %2230 = vsyncpa [#allocation8], 1 }
 0x76d   :  { %2232 = vsyncpa [#allocation8 + $0x1], 1 }
 0x76e   :  { %2233 = vsyncpa [#allocation11], 1 }
 0x76f   :  { %2235 = vsyncpa [#allocation11 + $0x1], 1 }
 0x770   :  { %2236 = vsyncpa [#allocation14], 1 }
 0x771   :  { %2238 = vsyncpa [#allocation14 + $0x1], 1 }
 0x772   :  { %2239 = vsyncpa [#allocation17], 1 }
 0x773   :  { %2241 = vsyncpa [#allocation17 + $0x1], 1 }
 0x774   :  { %2242 = vsyncpa [#allocation20], 1 }
 0x775   :  { %2243 = vsyncpa [#allocation23], 1 }

</bundles_post_ra>
